<compile_context>
chip_gen: v6e
topology: v6e:2x2x1
jax: 0.10.0
libtpu: 0.0.40
codegen_flags: <defaults>
</compile_context>

<pallas_src>
import jax
import jax.numpy as jnp
from jax.experimental import pallas as pl
from jax.experimental.pallas import tpu as pltpu

LANE = 128  # TPU lane width


def _round_up(n, m):
    return (n + m - 1) // m * m


def _pad2(a, rows, cols):
    r, c = a.shape
    return jnp.pad(a, ((0, rows - r), (0, cols - c)))


def classifier_kernel(x_ref, w1_ref, b1_ref, w2_ref, b2_ref, w3_ref, b3_ref,
                      o_ref):
    """Fused 3-layer MLP on one (rows, features) tile; shapes come from refs."""
    hp = jax.lax.Precision.HIGHEST
    x = x_ref[...]
    # layer1 + ReLU   (MXU matmul, f32 accumulate)
    y = jnp.maximum(
        jnp.dot(x, w1_ref[...], preferred_element_type=jnp.float32,
                precision=hp) + b1_ref[...], 0.0)
    # layer2 + ReLU
    z = jnp.maximum(
        jnp.dot(y, w2_ref[...], preferred_element_type=jnp.float32,
                precision=hp) + b2_ref[...], 0.0)
    # layer3 (no activation)
    o_ref[...] = (jnp.dot(z, w3_ref[...], preferred_element_type=jnp.float32,
                          precision=hp) + b3_ref[...]).astype(o_ref.dtype)


def _const_spec(shape):
    # Same block every grid step -> DMA'd once, stays VMEM-resident.
    return pl.BlockSpec(shape, lambda i: (0, 0))


def _forward_compact(x, params, row_tile):
    """Primary path: natural-width HBM I/O, padding only inside VMEM."""
    w1, b1, w2, b2, w3, b3 = params
    B, n_in = x.shape
    n_out = w3.shape[1]

    tb = min(row_tile, _round_up(B, 8))   # sublane-aligned row tile
    grid = (pl.cdiv(B, tb),)              # partial edge block OK (row-wise op)

    return pl.pallas_call(
        classifier_kernel,
        out_shape=jax.ShapeDtypeStruct((B, n_out), jnp.float32),
        grid=grid,
        in_specs=[pl.BlockSpec((tb, n_in), lambda i: (i, 0)),
                  _const_spec(w1.shape), _const_spec(b1.shape),
                  _const_spec(w2.shape), _const_spec(b2.shape),
                  _const_spec(w3.shape), _const_spec(b3.shape)],
        out_specs=pl.BlockSpec((tb, n_out), lambda i: (i, 0)),
        compiler_params=pltpu.CompilerParams(
            dimension_semantics=("parallel",)),
    )(x.astype(jnp.float32), w1, b1, w2, b2, w3, b3)


def _forward_padded(x, params, row_tile):
    """Fallback path: everything zero-padded to 128 lanes (always lowerable).

    Zero padding is exact through bias-add / ReLU / linear; padded lanes and
    rows are sliced off afterwards.
    """
    w1, b1, w2, b2, w3, b3 = params
    B, _ = x.shape
    n_out = w3.shape[1]

    tb = min(row_tile, _round_up(B, 8))
    b_pad = _round_up(B, tb)

    xp = _pad2(x.astype(jnp.float32), b_pad, LANE)
    w1p, w2p, w3p = (_pad2(w, LANE, LANE) for w in (w1, w2, w3))
    b1p, b2p, b3p = (_pad2(b, 1, LANE) for b in (b1, b2, b3))

    row_spec = pl.BlockSpec((tb, LANE), lambda i: (i, 0))
    out_padded = pl.pallas_call(
        classifier_kernel,
        out_shape=jax.ShapeDtypeStruct((b_pad, LANE), jnp.float32),
        grid=(b_pad // tb,),
        in_specs=[row_spec,
                  _const_spec((LANE, LANE)), _const_spec((1, LANE)),
                  _const_spec((LANE, LANE)), _const_spec((1, LANE)),
                  _const_spec((LANE, LANE)), _const_spec((1, LANE))],
        out_specs=row_spec,
        compiler_params=pltpu.CompilerParams(
            dimension_semantics=("parallel",)),
    )(xp, w1p, b1p, w2p, b2p, w3p, b3p)
    return out_padded[:B, :n_out]


_COMPACT_OK = None  # lazily-probed Mosaic capability flag


def classifier_forward(x, params, *, row_tile=2048):
    """3-layer MLP forward pass as a single fused Pallas call.

    x: (batch, n_inputs) float32.  params: (w1, b1, w2, b2, w3, b3) with
    weights (in, out) and biases (1, out).  Returns (batch, n_outputs).
    """
    global _COMPACT_OK
    if _COMPACT_OK is not False:
        try:
            out = jax.block_until_ready(_forward_compact(x, params, row_tile))
            _COMPACT_OK = True
            return out
        except Exception:
            # Some Mosaic builds reject the small non-128-aligned matmul
            # shapes; fall back to the fully lane-padded variant.
            _COMPACT_OK = False
    return _forward_padded(x, params, row_tile)


def init_params(key, n_inputs, n_outputs):
    """Deterministic init mimicking nn.Linear's U(-1/sqrt(fan_in), 1/sqrt(fan_in))."""
    hidden = (n_inputs + n_outputs) // 2

    def linear(key, fan_in, fan_out):
        kw, kb = jax.random.split(key)
        bound = 1.0 / jnp.sqrt(float(fan_in))
        w = jax.random.uniform(kw, (fan_in, fan_out), jnp.float32, -bound, bound)
        # bias kept 2D (1, fan_out) so it broadcasts cleanly inside the kernel
        b = jax.random.uniform(kb, (1, fan_out), jnp.float32, -bound, bound)
        return w, b

    k1, k2, k3 = jax.random.split(key, 3)
    w1, b1 = linear(k1, n_inputs, hidden)
    w2, b2 = linear(k2, hidden, hidden)
    w3, b3 = linear(k3, hidden, n_outputs)
    return (w1, b1, w2, b2, w3, b3)


def reference_forward(x, params):
    """Plain-JAX reference (highest-precision matmuls) for correctness checks."""
    w1, b1, w2, b2, w3, b3 = params
    hp = jax.lax.Precision.HIGHEST
    y = jnp.maximum(jnp.dot(x, w1, precision=hp) + b1, 0.0)
    z = jnp.maximum(jnp.dot(y, w2, precision=hp) + b2, 0.0)
    return jnp.dot(z, w3, precision=hp) + b3


if __name__ == "__main__":
    n_inputs, n_outputs = 10, 2

    key = jax.random.PRNGKey(0)
    kx, kp, kx2 = jax.random.split(key, 3)
    params = init_params(kp, n_inputs, n_outputs)

    # Small batch (single grid step).
    batch = 8
    x = jax.random.normal(kx, (batch, n_inputs), jnp.float32)
    out = jax.block_until_ready(classifier_forward(x, params))
    ref = reference_forward(x, params)
    assert out.shape == (batch, n_outputs)
    assert jnp.allclose(out, ref, atol=1e-5, rtol=1e-5)

    # Larger batch exercising the batch grid + a partial (masked) edge block.
    batch2 = 40
    x2 = jax.random.normal(kx2, (batch2, n_inputs), jnp.float32)
    out2 = jax.block_until_ready(classifier_forward(x2, params, row_tile=16))
    ref2 = reference_forward(x2, params)
    assert out2.shape == (batch2, n_outputs)
    assert jnp.allclose(out2, ref2, atol=1e-5, rtol=1e-5)

    print("KERNEL_OK")
</pallas_src>

<mosaic_0001>
module attributes {stable_mosaic.version = 11 : i64} {
  func.func @classifier_kernel(%arg0: i32, %arg1: memref<8x10xf32, #tpu.memory_space<vmem>>, %arg2: memref<10x6xf32, #tpu.memory_space<vmem>>, %arg3: memref<1x6xf32, #tpu.memory_space<vmem>>, %arg4: memref<6x6xf32, #tpu.memory_space<vmem>>, %arg5: memref<1x6xf32, #tpu.memory_space<vmem>>, %arg6: memref<6x2xf32, #tpu.memory_space<vmem>>, %arg7: memref<1x2xf32, #tpu.memory_space<vmem>>, %arg8: memref<8x2xf32, #tpu.memory_space<vmem>>) attributes {dimension_semantics = [#tpu.dimension_semantics<parallel>], iteration_bounds = array<i64: 1>, scalar_prefetch = 0 : i64, scratch_operands = 0 : i64, tpu.core_type = #tpu.core_type<tc>, window_params = [{transform_indices = @transform_0, window_bounds = array<i64: 8, 10>}, {pipeline_mode = #tpu.pipeline_mode<synchronous>, transform_indices = @transform_1, window_bounds = array<i64: 10, 6>}, {pipeline_mode = #tpu.pipeline_mode<synchronous>, transform_indices = @transform_2, window_bounds = array<i64: 1, 6>}, {pipeline_mode = #tpu.pipeline_mode<synchronous>, transform_indices = @transform_3, window_bounds = array<i64: 6, 6>}, {pipeline_mode = #tpu.pipeline_mode<synchronous>, transform_indices = @transform_4, window_bounds = array<i64: 1, 6>}, {pipeline_mode = #tpu.pipeline_mode<synchronous>, transform_indices = @transform_5, window_bounds = array<i64: 6, 2>}, {pipeline_mode = #tpu.pipeline_mode<synchronous>, transform_indices = @transform_6, window_bounds = array<i64: 1, 2>}, {transform_indices = @transform_7, window_bounds = array<i64: 8, 2>}]} {
    %c0 = arith.constant 0 : index
    %c0_0 = arith.constant 0 : index
    %0 = vector.load %arg1[%c0, %c0_0] : memref<8x10xf32, #tpu.memory_space<vmem>>, vector<8x10xf32>
    %c0_1 = arith.constant 0 : index
    %c0_2 = arith.constant 0 : index
    %1 = vector.load %arg2[%c0_1, %c0_2] : memref<10x6xf32, #tpu.memory_space<vmem>>, vector<10x6xf32>
    %cst = arith.constant dense<0.000000e+00> : vector<8x6xf32>
    %2 = tpu.matmul %0, %1, %cst {dimension_numbers = #tpu.dot_dimension_numbers<[1], [0], [0], [1], [0, 0, 1, 1], [], []>, precision = #tpu.contract_precision<fp32>} : vector<8x10xf32>, vector<10x6xf32>, vector<8x6xf32> -> vector<8x6xf32>
    %c0_3 = arith.constant 0 : index
    %c0_4 = arith.constant 0 : index
    %3 = vector.load %arg3[%c0_3, %c0_4] : memref<1x6xf32, #tpu.memory_space<vmem>>, vector<1x6xf32>
    %4 = vector.broadcast %3 : vector<1x6xf32> to vector<8x6xf32>
    %5 = arith.addf %2, %4 : vector<8x6xf32>
    %cst_5 = arith.constant 0.000000e+00 : f32
    %6 = vector.broadcast %cst_5 : f32 to vector<8x6xf32>
    %7 = arith.maximumf %5, %6 : vector<8x6xf32>
    %c0_6 = arith.constant 0 : index
    %c0_7 = arith.constant 0 : index
    %8 = vector.load %arg4[%c0_6, %c0_7] : memref<6x6xf32, #tpu.memory_space<vmem>>, vector<6x6xf32>
    %cst_8 = arith.constant dense<0.000000e+00> : vector<8x6xf32>
    %9 = tpu.matmul %7, %8, %cst_8 {dimension_numbers = #tpu.dot_dimension_numbers<[1], [0], [0], [1], [0, 0, 1, 1], [], []>, precision = #tpu.contract_precision<fp32>} : vector<8x6xf32>, vector<6x6xf32>, vector<8x6xf32> -> vector<8x6xf32>
    %c0_9 = arith.constant 0 : index
    %c0_10 = arith.constant 0 : index
    %10 = vector.load %arg5[%c0_9, %c0_10] : memref<1x6xf32, #tpu.memory_space<vmem>>, vector<1x6xf32>
    %11 = vector.broadcast %10 : vector<1x6xf32> to vector<8x6xf32>
    %12 = arith.addf %9, %11 : vector<8x6xf32>
    %cst_11 = arith.constant 0.000000e+00 : f32
    %13 = vector.broadcast %cst_11 : f32 to vector<8x6xf32>
    %14 = arith.maximumf %12, %13 : vector<8x6xf32>
    %c0_12 = arith.constant 0 : index
    %c0_13 = arith.constant 0 : index
    %15 = vector.load %arg6[%c0_12, %c0_13] : memref<6x2xf32, #tpu.memory_space<vmem>>, vector<6x2xf32>
    %cst_14 = arith.constant dense<0.000000e+00> : vector<8x2xf32>
    %16 = tpu.matmul %14, %15, %cst_14 {dimension_numbers = #tpu.dot_dimension_numbers<[1], [0], [0], [1], [0, 0, 1, 1], [], []>, precision = #tpu.contract_precision<fp32>} : vector<8x6xf32>, vector<6x2xf32>, vector<8x2xf32> -> vector<8x2xf32>
    %c0_15 = arith.constant 0 : index
    %c0_16 = arith.constant 0 : index
    %17 = vector.load %arg7[%c0_15, %c0_16] : memref<1x2xf32, #tpu.memory_space<vmem>>, vector<1x2xf32>
    %18 = vector.broadcast %17 : vector<1x2xf32> to vector<8x2xf32>
    %19 = arith.addf %16, %18 : vector<8x2xf32>
    %c0_17 = arith.constant 0 : index
    %c0_18 = arith.constant 0 : index
    %20 = vector.load %arg8[%c0_17, %c0_18] : memref<8x2xf32, #tpu.memory_space<vmem>>, vector<8x2xf32>
    tpu.vector_store %arg8[%c0_17, %c0_18], %19 {strides = array<i32>} : memref<8x2xf32, #tpu.memory_space<vmem>>, vector<8x2xf32>,
    return
  }
  func.func @transform_0(%arg0: i32) -> (i32, i32) {
    %c0_i32 = arith.constant 0 : i32
    %c0_i32_0 = arith.constant 0 : i32
    return %arg0, %c0_i32 : i32, i32
  }
  func.func @transform_1(%arg0: i32) -> (i32, i32) {
    %c0_i32 = arith.constant 0 : i32
    %c0_i32_0 = arith.constant 0 : i32
    %c0_i32_1 = arith.constant 0 : i32
    return %c0_i32, %c0_i32_0 : i32, i32
  }
  func.func @transform_2(%arg0: i32) -> (i32, i32) {
    %c0_i32 = arith.constant 0 : i32
    %c0_i32_0 = arith.constant 0 : i32
    %c0_i32_1 = arith.constant 0 : i32
    return %c0_i32, %c0_i32_0 : i32, i32
  }
  func.func @transform_3(%arg0: i32) -> (i32, i32) {
    %c0_i32 = arith.constant 0 : i32
    %c0_i32_0 = arith.constant 0 : i32
    %c0_i32_1 = arith.constant 0 : i32
    return %c0_i32, %c0_i32_0 : i32, i32
  }
  func.func @transform_4(%arg0: i32) -> (i32, i32) {
    %c0_i32 = arith.constant 0 : i32
    %c0_i32_0 = arith.constant 0 : i32
    %c0_i32_1 = arith.constant 0 : i32
    return %c0_i32, %c0_i32_0 : i32, i32
  }
  func.func @transform_5(%arg0: i32) -> (i32, i32) {
    %c0_i32 = arith.constant 0 : i32
    %c0_i32_0 = arith.constant 0 : i32
    %c0_i32_1 = arith.constant 0 : i32
    return %c0_i32, %c0_i32_0 : i32, i32
  }
  func.func @transform_6(%arg0: i32) -> (i32, i32) {
    %c0_i32 = arith.constant 0 : i32
    %c0_i32_0 = arith.constant 0 : i32
    %c0_i32_1 = arith.constant 0 : i32
    return %c0_i32, %c0_i32_0 : i32, i32
  }
  func.func @transform_7(%arg0: i32) -> (i32, i32) {
    %c0_i32 = arith.constant 0 : i32
    %c0_i32_0 = arith.constant 0 : i32
    return %arg0, %c0_i32 : i32, i32
  }
}

module attributes {stable_mosaic.version = 11 : i64} {
  func.func @classifier_kernel(%arg0: i32, %arg1: memref<8x128xf32, #tpu.memory_space<vmem>>, %arg2: memref<128x128xf32, #tpu.memory_space<vmem>>, %arg3: memref<1x128xf32, #tpu.memory_space<vmem>>, %arg4: memref<128x128xf32, #tpu.memory_space<vmem>>, %arg5: memref<1x128xf32, #tpu.memory_space<vmem>>, %arg6: memref<128x128xf32, #tpu.memory_space<vmem>>, %arg7: memref<1x128xf32, #tpu.memory_space<vmem>>, %arg8: memref<8x128xf32, #tpu.memory_space<vmem>>) attributes {dimension_semantics = [#tpu.dimension_semantics<parallel>], iteration_bounds = array<i64: 1>, scalar_prefetch = 0 : i64, scratch_operands = 0 : i64, tpu.core_type = #tpu.core_type<tc>, window_params = [{transform_indices = @transform_0, window_bounds = array<i64: 8, 128>}, {pipeline_mode = #tpu.pipeline_mode<synchronous>, transform_indices = @transform_1, window_bounds = array<i64: 128, 128>}, {pipeline_mode = #tpu.pipeline_mode<synchronous>, transform_indices = @transform_2, window_bounds = array<i64: 1, 128>}, {pipeline_mode = #tpu.pipeline_mode<synchronous>, transform_indices = @transform_3, window_bounds = array<i64: 128, 128>}, {pipeline_mode = #tpu.pipeline_mode<synchronous>, transform_indices = @transform_4, window_bounds = array<i64: 1, 128>}, {pipeline_mode = #tpu.pipeline_mode<synchronous>, transform_indices = @transform_5, window_bounds = array<i64: 128, 128>}, {pipeline_mode = #tpu.pipeline_mode<synchronous>, transform_indices = @transform_6, window_bounds = array<i64: 1, 128>}, {transform_indices = @transform_7, window_bounds = array<i64: 8, 128>}]} {
    %c0 = arith.constant 0 : index
    %c0_0 = arith.constant 0 : index
    %0 = vector.load %arg1[%c0, %c0_0] : memref<8x128xf32, #tpu.memory_space<vmem>>, vector<8x128xf32>
    %c0_1 = arith.constant 0 : index
    %c0_2 = arith.constant 0 : index
    %1 = vector.load %arg2[%c0_1, %c0_2] : memref<128x128xf32, #tpu.memory_space<vmem>>, vector<128x128xf32>
    %cst = arith.constant dense<0.000000e+00> : vector<8x128xf32>
    %2 = tpu.matmul %0, %1, %cst {dimension_numbers = #tpu.dot_dimension_numbers<[1], [0], [0], [1], [0, 0, 1, 1], [], []>, precision = #tpu.contract_precision<fp32>} : vector<8x128xf32>, vector<128x128xf32>, vector<8x128xf32> -> vector<8x128xf32>
    %c0_3 = arith.constant 0 : index
    %c0_4 = arith.constant 0 : index
    %3 = vector.load %arg3[%c0_3, %c0_4] : memref<1x128xf32, #tpu.memory_space<vmem>>, vector<1x128xf32>
    %4 = vector.broadcast %3 : vector<1x128xf32> to vector<8x128xf32>
    %5 = arith.addf %2, %4 : vector<8x128xf32>
    %cst_5 = arith.constant 0.000000e+00 : f32
    %6 = vector.broadcast %cst_5 : f32 to vector<8x128xf32>
    %7 = arith.maximumf %5, %6 : vector<8x128xf32>
    %c0_6 = arith.constant 0 : index
    %c0_7 = arith.constant 0 : index
    %8 = vector.load %arg4[%c0_6, %c0_7] : memref<128x128xf32, #tpu.memory_space<vmem>>, vector<128x128xf32>
    %cst_8 = arith.constant dense<0.000000e+00> : vector<8x128xf32>
    %9 = tpu.matmul %7, %8, %cst_8 {dimension_numbers = #tpu.dot_dimension_numbers<[1], [0], [0], [1], [0, 0, 1, 1], [], []>, precision = #tpu.contract_precision<fp32>} : vector<8x128xf32>, vector<128x128xf32>, vector<8x128xf32> -> vector<8x128xf32>
    %c0_9 = arith.constant 0 : index
    %c0_10 = arith.constant 0 : index
    %10 = vector.load %arg5[%c0_9, %c0_10] : memref<1x128xf32, #tpu.memory_space<vmem>>, vector<1x128xf32>
    %11 = vector.broadcast %10 : vector<1x128xf32> to vector<8x128xf32>
    %12 = arith.addf %9, %11 : vector<8x128xf32>
    %cst_11 = arith.constant 0.000000e+00 : f32
    %13 = vector.broadcast %cst_11 : f32 to vector<8x128xf32>
    %14 = arith.maximumf %12, %13 : vector<8x128xf32>
    %c0_12 = arith.constant 0 : index
    %c0_13 = arith.constant 0 : index
    %15 = vector.load %arg6[%c0_12, %c0_13] : memref<128x128xf32, #tpu.memory_space<vmem>>, vector<128x128xf32>
    %cst_14 = arith.constant dense<0.000000e+00> : vector<8x128xf32>
    %16 = tpu.matmul %14, %15, %cst_14 {dimension_numbers = #tpu.dot_dimension_numbers<[1], [0], [0], [1], [0, 0, 1, 1], [], []>, precision = #tpu.contract_precision<fp32>} : vector<8x128xf32>, vector<128x128xf32>, vector<8x128xf32> -> vector<8x128xf32>
    %c0_15 = arith.constant 0 : index
    %c0_16 = arith.constant 0 : index
    %17 = vector.load %arg7[%c0_15, %c0_16] : memref<1x128xf32, #tpu.memory_space<vmem>>, vector<1x128xf32>
    %18 = vector.broadcast %17 : vector<1x128xf32> to vector<8x128xf32>
    %19 = arith.addf %16, %18 : vector<8x128xf32>
    %c0_17 = arith.constant 0 : index
    %c0_18 = arith.constant 0 : index
    %20 = vector.load %arg8[%c0_17, %c0_18] : memref<8x128xf32, #tpu.memory_space<vmem>>, vector<8x128xf32>
    tpu.vector_store %arg8[%c0_17, %c0_18], %19 {strides = array<i32>} : memref<8x128xf32, #tpu.memory_space<vmem>>, vector<8x128xf32>,
    return
  }
  func.func @transform_0(%arg0: i32) -> (i32, i32) {
    %c0_i32 = arith.constant 0 : i32
    %c0_i32_0 = arith.constant 0 : i32
    return %arg0, %c0_i32 : i32, i32
  }
  func.func @transform_1(%arg0: i32) -> (i32, i32) {
    %c0_i32 = arith.constant 0 : i32
    %c0_i32_0 = arith.constant 0 : i32
    %c0_i32_1 = arith.constant 0 : i32
    return %c0_i32, %c0_i32_0 : i32, i32
  }
  func.func @transform_2(%arg0: i32) -> (i32, i32) {
    %c0_i32 = arith.constant 0 : i32
    %c0_i32_0 = arith.constant 0 : i32
    %c0_i32_1 = arith.constant 0 : i32
    return %c0_i32, %c0_i32_0 : i32, i32
  }
  func.func @transform_3(%arg0: i32) -> (i32, i32) {
    %c0_i32 = arith.constant 0 : i32
    %c0_i32_0 = arith.constant 0 : i32
    %c0_i32_1 = arith.constant 0 : i32
    return %c0_i32, %c0_i32_0 : i32, i32
  }
  func.func @transform_4(%arg0: i32) -> (i32, i32) {
    %c0_i32 = arith.constant 0 : i32
    %c0_i32_0 = arith.constant 0 : i32
    %c0_i32_1 = arith.constant 0 : i32
    return %c0_i32, %c0_i32_0 : i32, i32
  }
  func.func @transform_5(%arg0: i32) -> (i32, i32) {
    %c0_i32 = arith.constant 0 : i32
    %c0_i32_0 = arith.constant 0 : i32
    %c0_i32_1 = arith.constant 0 : i32
    return %c0_i32, %c0_i32_0 : i32, i32
  }
  func.func @transform_6(%arg0: i32) -> (i32, i32) {
    %c0_i32 = arith.constant 0 : i32
    %c0_i32_0 = arith.constant 0 : i32
    %c0_i32_1 = arith.constant 0 : i32
    return %c0_i32, %c0_i32_0 : i32, i32
  }
  func.func @transform_7(%arg0: i32) -> (i32, i32) {
    %c0_i32 = arith.constant 0 : i32
    %c0_i32_0 = arith.constant 0 : i32
    return %arg0, %c0_i32 : i32, i32
  }
}

</mosaic_0001>

<bundles_post_ra>
// kernel: tpu_custom_call.1
= control target key start
LH: loop header
LB: loop body
LE: loop exit
PB: predicated region body
PF: predicated region fallthrough
CT: control target
= control target key end

     0   :  { %vm40_vm0 = vcmask 1041408   ;;  %vm36_vm1 = vcmask 80896   ;;  %v1582_v0 = vmov 0.0   ;;  %vm1583_vm2 = vmmov 0   ;;  %s1715_s1 = inlined_call_operand.vmem [shape: f32[10,6], index: 1, kind: input, shape index: {}]   ;;  %s1716_s0 = inlined_call_operand.vmem [shape: f32[8,10], index: 0, kind: input, shape index: {}]   ;;  %s1717_s3 = inlined_call_operand.vmem [shape: f32[6,6], index: 3, kind: input, shape index: {}]   ;;  %s1718_s2 = inlined_call_operand.vmem [shape: f32[1,6], index: 2, kind: input, shape index: {}]   ;;  %s1719_s5 = inlined_call_operand.vmem [shape: f32[6,2], index: 5, kind: input, shape index: {}]   ;;  %s1720_s4 = inlined_call_operand.vmem [shape: f32[1,6], index: 4, kind: input, shape index: {}]   ;;  %s1721_s6 = inlined_call_operand.vmem [shape: f32[1,2], index: 6, kind: input, shape index: {}]   ;;  %s1722_s7 = inlined_call_operand.vmem [shape: f32[8,2], index: 7, kind: output, shape index: {}]  }
   0x1   :  { %1478 = vmatprep.subr.mxu0 %v1582_v0  ;;  %v28_v1 = vld [vmem:[%s1715_s1 + $0x8] sm:$0x3]  ;;  %v27_v2 = vld [vmem:[%s1715_s1] sm:$0xff]  ;;  %1482 = vmatprep.mubr.msk.f32.mxu0 %vm1583_vm2, %v1582_v0  ;;  %vm516_vm3 = vcmask 1045504   ;;  %vm512_vm4 = vcmask 48128   ;;  %vm1427_vm5 = vcmask 15360  }
   0x2   :  { %v26_v3 = vld [vmem:[%s1716_s0] sm:$0xff]  ;;  %v42_v4 = vsel %vm40_vm0, %v28_v1, 0  ;;  %v76_v5 = vand.u32 4294901760, %v27_v2  ;;  %1485 = vmatprep.subr.mxu1 %v1582_v0  ;;  %1489 = vmatprep.mubr.msk.f32.mxu1 %vm1583_vm2, %v1582_v0 }
   0x3   :  { %v38_v6 = vsel %vm36_vm1, %v26_v3, 0  ;;  %v73_v7 = vand.u32 4294901760, %v42_v4  ;;  %v504_v21 = vld [vmem:[%s1717_s3] sm:$0x3f] }
   0x4   :  { %v111_v8 = vand.u32 4294901760, %v38_v6  ;;  %v158_v9 = vsub.f32 %v27_v2, %v76_v5  ;;  %v518_v22 = vsel %vm516_vm3, %v504_v21, 0  ;;  %v1433_v28 = vld [vmem:[%s1718_s2] ss:$0 sm:$0xff] }
   0x5   :  { %1479 = vmatpush3.msra.mxu0 %v73_v7  ;;  %v151_v11 = vsub.f32 %v42_v4, %v73_v7  ;;  %v551_v23 = vand.u32 4294901760, %v518_v22  ;;  %v967_v54 = vld [vmem:[%s1719_s5] sm:$0x3f] }
   0x6   :  { %v112_v10 = vsub.f32 %v38_v6, %v111_v8  ;;  %1480 = vmatprep.subr.mxu0 %v1582_v0  ;;  %v159_v12 = vand.u32 4294901760, %v158_v9  ;;  %v979_v55 = vsel %vm516_vm3, %v967_v54, 0  ;;  %v1434_v2 = vld [vmem:[%s1720_s4] ss:$0 sm:$0xff] }
   0x7   :  { %1481 = vmatpush3.msra.mxu0 %v76_v5  ;;  %v152_v14 = vand.u32 4294901760, %v151_v11  ;;  %v628_v24 = vsub.f32 %v518_v22, %v551_v23  ;;  %v1012_v56 = vand.u32 4294901760, %v979_v55 }
   0x8   :  { %v113_v13 = vand.u32 4294901760, %v112_v10  ;;  %1492 = vmatprep.subr.mxu0 %v1582_v0  ;;  %v160_v15 = vsub.f32 %v158_v9, %v159_v12 }
   0x9   :  { %v153_v17 = vsub.f32 %v151_v11, %v152_v14  ;;  %v629_v25 = vand.u32 4294901760, %v628_v24  ;;  %v1089_v57 = vsub.f32 %v979_v55, %v1012_v56 }
   0xa   :  { %v114_v16 = vsub.f32 %v112_v10, %v113_v13  ;;  %v161_v20 = vand.u32 4294901760, %v160_v15 }
   0xb   :  { %v154_v19 = vand.u32 4294901760, %v153_v17  ;;  %v630_v26 = vsub.f32 %v628_v24, %v629_v25  ;;  %v1090_v58 = vand.u32 4294901760, %v1089_v57 }
   0xc   :  { %v115_v18 = vand.u32 4294901760, %v114_v16 }
   0xd   :  { %1486 = vmatpush3.msra.mxu1 %v154_v19  ;;  %v631_v27 = vand.u32 4294901760, %v630_v26  ;;  %v1091_v59 = vsub.f32 %v1089_v57, %v1090_v58 }
   0xe   :  { %1483 = vmatmul.mubr.f32.vlgmr.msra.gmra.mxu0 %v115_v18  ;;  %1487 = vmatprep.subr.mxu1 %v1582_v0 }
   0xf   :  { %1493 = vmatpush3.msra.mxu0 %v151_v11  ;;  %1488 = vmatpush3.msra.mxu1 %v161_v20  ;;  %v1092_v60 = vand.u32 4294901760, %v1091_v59 }
  0x10   :  { %1494 = vmatprep.subr.mxu0 %v1582_v0  ;;  %1490 = vmatmul.mubr.f32.vlgmr.msra.gmra.mxu1 %v111_v8 }
  0x11   :  { %1495 = vmatpush3.msra.mxu0 %v158_v9  ;;  %1496 = vmatprep.mubr.msk.f32.mxu0 %vm1583_vm2, %v1582_v0 }
  0x12   :  { %1499 = vmatprep.subr.mxu1 %v1582_v0  ;;  %1497 = vmatmul.mubr.f32.vlgmr.msra.gmra.mxu0 %v112_v10 }
  0x13   :  { %1500 = vmatpush3.msra.mxu1 %v73_v7  ;;  %1506 = vmatprep.subr.mxu0 %v1582_v0 }
  0x14   :  { %1501 = vmatprep.subr.mxu1 %v1582_v0  ;;  %1507 = vmatpush3.msra.mxu0 %v152_v14 }
  0x15   :  { %1502 = vmatpush3.msra.mxu1 %v76_v5  ;;  %1503 = vmatprep.mubr.msk.f32.mxu1 %vm1583_vm2, %v1582_v0 }
  0x16   :  { %1508 = vmatprep.subr.mxu0 %v1582_v0  ;;  %1504 = vmatmul.mubr.f32.vlgmr.msra.gmra.mxu1 %v113_v13 }
  0x17   :  { %1509 = vmatpush3.msra.mxu0 %v159_v12  ;;  %1510 = vmatprep.mubr.msk.f32.mxu0 %vm1583_vm2, %v1582_v0 }
  0x18   :  { %1513 = vmatprep.subr.mxu1 %v1582_v0  ;;  %1511 = vmatmul.mubr.f32.vlgmr.msra.gmra.mxu0 %v111_v8 }
  0x19   :  { %1514 = vmatpush3.msra.mxu1 %v73_v7  ;;  %1517 = vmatprep.mubr.msk.f32.mxu1 %vm1583_vm2, %v1582_v0 }
  0x1a   :  { %1515 = vmatprep.subr.mxu1 %v1582_v0  ;;  %1520 = vmatprep.subr.mxu0 %v1582_v0 }
  0x1b   :  { %1516 = vmatpush3.msra.mxu1 %v76_v5  ;;  %1522 = vmatprep.mubr.msk.f32.mxu0 %vm1583_vm2, %v1582_v0 }
  0x1c   :  { %1518 = vmatmul.mubr.f32.vlgmr.msra.gmra.mxu1 %v111_v8  ;;  %1525 = vmatprep.subr.mxu1 %v1582_v0 }
  0x1d   :  { %1527 = vmatprep.mubr.msk.f32.mxu1 %vm1583_vm2, %v1582_v0  ;;  %1521 = vmatpush3.msra.mxu0 %v551_v23 }
  0x1e   :  { %1530 = vmatprep.subr.mxu0 %v1582_v0  ;;  %1526 = vmatpush3.msra.mxu1 %v631_v27 }
  0x1f   :  { %1535 = vmatprep.subr.mxu1 %v1582_v0 }
  0xce   :  { %v117_v29 = vpop.f32.mrf.mxu0 }
  0xcf   :  { %v118_v30 = vadd.f32 %v1433_v28, %v117_v29  ;;  %v1435_v28 = vld [vmem:[%s1721_s6] ss:$0 sm:$0xff] }
  0xd0   :  { %v1484_v31 = vpop.f32.mrf.mxu0  ;;  %v198_v32 = vpop.f32.mrf.mxu1 }
  0xd1   :  { %v199_v33 = vadd.f32 %v198_v32, %v118_v30 }
  0xd2   :  { %v274_v34 = vpop.f32.mrf.mxu0  ;;  %v1491_v35 = vpop.f32.mrf.mxu1 }
  0xd3   :  { %v275_v36 = vadd.f32 %v274_v34, %v199_v33 }
  0xd4   :  { %v1498_v37 = vpop.f32.mrf.mxu0 }
  0xd6   :  { %v349_v38 = vpop.f32.mrf.mxu1 }
  0xd7   :  { %v350_v39 = vadd.f32 %v349_v38, %v275_v36 }
  0xd8   :  { %v426_v40 = vpop.f32.mrf.mxu0  ;;  %v1505_v41 = vpop.f32.mrf.mxu1 }
  0xd9   :  { %v427_v42 = vadd.f32 %v426_v40, %v350_v39 }
  0xda   :  { %v1512_v43 = vpop.f32.mrf.mxu0 }
  0xdc   :  { %v499_v44 = vpop.f32.mrf.mxu1 }
  0xdd   :  { %v500_v45 = vadd.f32 %v499_v44, %v427_v42 }
  0xde   :  { %v1519_v46 = vpop.f32.mrf.mxu1 }
  0xdf   :  { %v503_v47 = vmax.f32 %v500_v45, 0.0 }
  0xe1   :  { %v514_v48 = vsel %vm512_vm4, %v503_v47, 0 }
  0xe2   :  { %v586_v49 = vand.u32 4294901760, %v514_v48 }
  0xe4   :  { %v587_v50 = vsub.f32 %v514_v48, %v586_v49  ;;  %1528 = vmatmul.mubr.f32.vlgmr.msra.gmra.mxu1 %v586_v49 }
  0xe5   :  { %1536 = vmatpush3.msra.mxu1 %v551_v23  ;;  %1537 = vmatprep.mubr.msk.f32.mxu1 %vm1583_vm2, %v1582_v0 }
  0xe6   :  { %v588_v51 = vand.u32 4294901760, %v587_v50  ;;  %1545 = vmatprep.subr.mxu1 %v1582_v0 }
  0xe8   :  { %1538 = vmatmul.mubr.f32.vlgmr.msra.gmra.mxu1 %v588_v51  ;;  %v589_v52 = vsub.f32 %v587_v50, %v588_v51 }
  0xe9   :  { %1546 = vmatpush3.msra.mxu1 %v551_v23  ;;  %1547 = vmatprep.mubr.msk.f32.mxu1 %vm1583_vm2, %v1582_v0 }
  0xea   :  { %v590_v53 = vand.u32 4294901760, %v589_v52  ;;  %1555 = vmatprep.subr.mxu1 %v1582_v0 }
  0xec   :  { %1523 = vmatmul.mubr.f32.vlgmr.msra.gmra.mxu0 %v590_v53  ;;  %1548 = vmatmul.mubr.f32.vlgmr.msra.gmra.mxu1 %v586_v49 }
  0xed   :  { %1531 = vmatpush3.msra.mxu0 %v628_v24  ;;  %1532 = vmatprep.mubr.msk.f32.mxu0 %vm1583_vm2, %v1582_v0 }
  0xee   :  { %1540 = vmatprep.subr.mxu0 %v1582_v0  ;;  %1557 = vmatprep.mubr.msk.f32.mxu1 %vm1583_vm2, %v1582_v0 }
  0xef   :  { %1556 = vmatpush3.msra.mxu1 %v1092_v60 }
  0xf0   :  { %1533 = vmatmul.mubr.f32.vlgmr.msra.gmra.mxu0 %v587_v50  ;;  %1565 = vmatprep.subr.mxu1 %v1582_v0 }
  0xf1   :  { %1541 = vmatpush3.msra.mxu0 %v629_v25  ;;  %1542 = vmatprep.mubr.msk.f32.mxu0 %vm1583_vm2, %v1582_v0 }
  0xf2   :  { %1550 = vmatprep.subr.mxu0 %v1582_v0 }
  0xf4   :  { %1543 = vmatmul.mubr.f32.vlgmr.msra.gmra.mxu0 %v586_v49 }
  0xf5   :  { %1552 = vmatprep.mubr.msk.f32.mxu0 %vm1583_vm2, %v1582_v0  ;;  %1551 = vmatpush3.msra.mxu0 %v1012_v56 }
  0xf6   :  { %1560 = vmatprep.subr.mxu0 %v1582_v0 }
 0x1a4   :  { %v668_v61 = vpop.f32.mrf.mxu1 }
 0x1a6   :  { %v1529_v62 = vpop.f32.mrf.mxu1 }
 0x1a8   :  { %v816_v63 = vpop.f32.mrf.mxu1 }
 0x1aa   :  { %v1539_v1 = vpop.f32.mrf.mxu1 }
 0x1ac   :  { %v592_v3 = vpop.f32.mrf.mxu0  ;;  %v962_v4 = vpop.f32.mrf.mxu1 }
 0x1ad   :  { %v593_v5 = vadd.f32 %v1434_v2, %v592_v3 }
 0x1ae   :  { %v1524_v6 = vpop.f32.mrf.mxu0  ;;  %v1549_v7 = vpop.f32.mrf.mxu1 }
 0x1af   :  { %v669_v8 = vadd.f32 %v668_v61, %v593_v5 }
 0x1b0   :  { %v742_v9 = vpop.f32.mrf.mxu0 }
 0x1b1   :  { %v743_v10 = vadd.f32 %v742_v9, %v669_v8 }
 0x1b2   :  { %v1534_v11 = vpop.f32.mrf.mxu0 }
 0x1b3   :  { %v817_v12 = vadd.f32 %v816_v63, %v743_v10 }
 0x1b4   :  { %v890_v13 = vpop.f32.mrf.mxu0 }
 0x1b5   :  { %v891_v14 = vadd.f32 %v890_v13, %v817_v12 }
 0x1b6   :  { %v1544_v15 = vpop.f32.mrf.mxu0 }
 0x1b7   :  { %v963_v16 = vadd.f32 %v962_v4, %v891_v14 }
 0x1b9   :  { %v966_v17 = vmax.f32 %v963_v16, 0.0 }
 0x1bb   :  { %v976_v18 = vsel %vm512_vm4, %v966_v17, 0 }
 0x1bc   :  { %v1047_v19 = vand.u32 4294901760, %v976_v18 }
 0x1be   :  { %v1048_v20 = vsub.f32 %v976_v18, %v1047_v19  ;;  %1558 = vmatmul.mubr.f32.vlgmr.msra.gmra.mxu1 %v1047_v19 }
 0x1bf   :  { %1566 = vmatpush3.msra.mxu1 %v1012_v56  ;;  %1567 = vmatprep.mubr.msk.f32.mxu1 %vm1583_vm2, %v1582_v0 }
 0x1c0   :  { %v1049_v21 = vand.u32 4294901760, %v1048_v20  ;;  %1575 = vmatprep.subr.mxu1 %v1582_v0 }
 0x1c2   :  { %1568 = vmatmul.mubr.f32.vlgmr.msra.gmra.mxu1 %v1049_v21  ;;  %v1050_v22 = vsub.f32 %v1048_v20, %v1049_v21 }
 0x1c3   :  { %1576 = vmatpush3.msra.mxu1 %v1012_v56  ;;  %1577 = vmatprep.mubr.msk.f32.mxu1 %vm1583_vm2, %v1582_v0 }
 0x1c4   :  { %v1051_v23 = vand.u32 4294901760, %v1050_v22 }
 0x1c6   :  { %1553 = vmatmul.mubr.f32.vlgmr.msra.gmra.mxu0 %v1051_v23  ;;  %1578 = vmatmul.mubr.f32.vlgmr.msra.gmra.mxu1 %v1047_v19 }
 0x1c7   :  { %1561 = vmatpush3.msra.mxu0 %v1089_v57  ;;  %1562 = vmatprep.mubr.msk.f32.mxu0 %vm1583_vm2, %v1582_v0 }
 0x1c8   :  { %1570 = vmatprep.subr.mxu0 %v1582_v0 }
 0x1ca   :  { %1563 = vmatmul.mubr.f32.vlgmr.msra.gmra.mxu0 %v1048_v20 }
 0x1cb   :  { %1571 = vmatpush3.msra.mxu0 %v1090_v58  ;;  %1572 = vmatprep.mubr.msk.f32.mxu0 %vm1583_vm2, %v1582_v0 }
 0x1ce   :  { %1573 = vmatmul.mubr.f32.vlgmr.msra.gmra.mxu0 %v1047_v19 }
 0x27e   :  { %v1129_v24 = vpop.f32.mrf.mxu1 }
 0x280   :  { %v1559_v25 = vpop.f32.mrf.mxu1 }
 0x282   :  { %v1277_v26 = vpop.f32.mrf.mxu1 }
 0x284   :  { %v1569_v27 = vpop.f32.mrf.mxu1 }
 0x286   :  { %v1053_v29 = vpop.f32.mrf.mxu0  ;;  %v1423_v30 = vpop.f32.mrf.mxu1 }
 0x287   :  { %v1054_v31 = vadd.f32 %v1435_v28, %v1053_v29 }
 0x288   :  { %v1554_v32 = vpop.f32.mrf.mxu0  ;;  %v1579_v33 = vpop.f32.mrf.mxu1 }
 0x289   :  { %v1130_v34 = vadd.f32 %v1129_v24, %v1054_v31 }
 0x28a   :  { %v1203_v35 = vpop.f32.mrf.mxu0 }
 0x28b   :  { %v1204_v36 = vadd.f32 %v1203_v35, %v1130_v34 }
 0x28c   :  { %v1564_v37 = vpop.f32.mrf.mxu0 }
 0x28d   :  { %v1278_v38 = vadd.f32 %v1277_v26, %v1204_v36 }
 0x28e   :  { %v1351_v0 = vpop.f32.mrf.mxu0 }
 0x28f   :  { %v1352_v39 = vadd.f32 %v1351_v0, %v1278_v38 }
 0x290   :  { %v1574_v40 = vpop.f32.mrf.mxu0 }
 0x291   :  { %v1424_v41 = vadd.f32 %v1423_v30, %v1352_v39 }
 0x293   :  { %1428 = vst.msk [vmem:[%s1722_s7] sm:$0xff] %vm1427_vm5, %v1424_v41 }

// kernel: tpu_custom_call.1
= control target key start
LH: loop header
LB: loop body
LE: loop exit
PB: predicated region body
PF: predicated region fallthrough
CT: control target
= control target key end

     0   :  { %12 = vsyncpa [#allocation3], 0  ;;  %s4312_s0 = inlined_call_operand.hbm [shape: f32[8,128], index: 0, kind: input, shape index: {}]   ;;  %s4313_s1 = inlined_call_operand.hbm [shape: f32[128,128], index: 1, kind: input, shape index: {}]   ;;  %s4314_s2 = inlined_call_operand.vmem [shape: f32[1,128], index: 2, kind: input, shape index: {}]   ;;  %s4315_s3 = inlined_call_operand.hbm [shape: f32[128,128], index: 3, kind: input, shape index: {}]   ;;  %s4316_s4 = inlined_call_operand.vmem [shape: f32[1,128], index: 4, kind: input, shape index: {}]   ;;  %s4317_s5 = inlined_call_operand.hbm [shape: f32[128,128], index: 5, kind: input, shape index: {}]   ;;  %s4318_s6 = inlined_call_operand.vmem [shape: f32[1,128], index: 6, kind: input, shape index: {}]   ;;  %s4319_s7 = inlined_call_operand.hbm [shape: f32[8,128], index: 7, kind: output, shape index: {}]  }
   0x1   :  { %13 = vsyncpa [#allocation6], 0 }
   0x2   :  { %14 = vsyncpa [#allocation9], 0 }
   0x3   :  { %15 = vsyncpa [#allocation4], 0  ;;  %s3149_s24 = smov [#allocation5]  }
   0x4   :  { %s31_s25 = sshll.u32 %s3149_s24, 4  ;;  %s32_s25 = int_to_ptr.vmem [resolvable:$true] %s31_s25 }
   0x5   :  { %s3049_s26 = scalar_lea.vmem %s32_s25, 2048  ;;  %p3054_p1 = scmp.lt.s32.totalorder %s32_s25, %s32_s25 }
   0x6   :  { %p3050_p0 = scmp.ne.s32.totalorder %s32_s25, %s3049_s26  ;;  %p3055_p2 = scmp.lt.s32.totalorder %s3049_s26, %s3049_s26 }
   0x8   :  { %p3056_p3 = por %p3055_p2, %p3054_p1 }
   0xa   :  { %p3057_p4 = pnand %p3056_p3, %p3050_p0 }
   0xc   :  { %3060 = shalt.err (!%p3057_p4)
}
   0xd   :  { %s3150_s27 = smov 128   ;;  %s3151_s28 = smov 8  }
   0xe   :  { %37 = dma.hbm_to_vmem [thread:$0]  %s4313_s1, 2048, %s32_s25, [#allocation6], %s3150_s27, %s3150_s27, %s3151_s28  }
   0xf   :  { %s3152_s8 = smov [#allocation2]   ;;  %s3153_s10 = smov [#allocation7]  }
  0x10   :  { %s22_s9 = sshll.u32 %s3152_s8, 4  ;;  %s45_s11 = sshll.u32 %s3153_s10, 4  ;;  %s23_s9 = int_to_ptr.vmem [resolvable:$true] %s22_s9  ;;  %s46_s11 = int_to_ptr.vmem [resolvable:$true] %s45_s11 }
  0x11   :  { %s3069_s12 = scalar_lea.vmem %s23_s9, 128  ;;  %p3074_p6 = scmp.lt.s32.totalorder %s23_s9, %s23_s9 }
  0x12   :  { %p3070_p5 = scmp.ne.s32.totalorder %s23_s9, %s3069_s12  ;;  %p3075_p7 = scmp.lt.s32.totalorder %s3069_s12, %s3069_s12 }
  0x14   :  { %p3076_p8 = por %p3075_p7, %p3074_p6 }
  0x16   :  { %p3077_p9 = pnand %p3076_p8, %p3070_p5 }
  0x18   :  { %3080 = shalt.err (!%p3077_p9)
}
  0x19   :  { %25 = dma.hbm_to_vmem [thread:$0]  %s4312_s0, 128, %s23_s9, [#allocation3]  }
  0x1a   :  { %s3089_s15 = scalar_lea.vmem %s46_s11, 2048  ;;  %p3094_p11 = scmp.lt.s32.totalorder %s46_s11, %s46_s11 }
  0x1b   :  { %p3090_p10 = scmp.ne.s32.totalorder %s46_s11, %s3089_s15  ;;  %p3095_p12 = scmp.lt.s32.totalorder %s3089_s15, %s3089_s15 }
  0x1d   :  { %p3096_p13 = por %p3095_p12, %p3094_p11 }
  0x1f   :  { %p3097_p0 = pnand %p3096_p13, %p3090_p10 }
  0x21   :  { %3100 = shalt.err (!%p3097_p0)
}
  0x22   :  { %51 = dma.hbm_to_vmem [thread:$0]  %s4315_s3, 2048, %s46_s11, [#allocation6], %s3150_s27, %s3150_s27, %s3151_s28  }
  0x23   :  { %s3154_s17 = smov [#allocation8]  }
  0x24   :  { %s59_s18 = sshll.u32 %s3154_s17, 4  ;;  %s60_s18 = int_to_ptr.vmem [resolvable:$true] %s59_s18 }
  0x25   :  { %s3109_s19 = scalar_lea.vmem %s60_s18, 2048  ;;  %p3114_p2 = scmp.lt.s32.totalorder %s60_s18, %s60_s18 }
  0x26   :  { %p3110_p1 = scmp.ne.s32.totalorder %s60_s18, %s3109_s19  ;;  %p3115_p3 = scmp.lt.s32.totalorder %s3109_s19, %s3109_s19 }
  0x28   :  { %p3116_p4 = por %p3115_p3, %p3114_p2 }
  0x2a   :  { %p3117_p5 = pnand %p3116_p4, %p3110_p1 }
  0x2c   :  { %3120 = shalt.err (!%p3117_p5)
}
  0x2d   :  { %65 = dma.hbm_to_vmem [thread:$0]  %s4317_s5, 2048, %s60_s18, [#allocation9], %s3150_s27, %s3150_s27, %s3151_s28  }
  0x2e   :  { %3141 = dma.done.wait [#allocation3], 128  }
  0x2f   :  { %3142 = vsyncadd [#allocation3], 4294967168 }
  0x30   :  { %3143 = dma.done.wait [#allocation6], 4096  }
  0x31   :  { %3144 = vsyncadd [#allocation6], 4294963200 }
  0x32   :  { %3145 = dma.done.wait [#allocation9], 2048  }
  0x33   :  { %3146 = vsyncadd [#allocation9], 4294965248  ;;  %v3155_v0 = vmov 0.0   ;;  %vm3156_vm0 = vmmov 0   ;;  %v96_v1 = vld [vmem:[#allocation5 + $0x78] sm:$0xff]  ;;  %v95_v2 = vld [vmem:[#allocation5 + $0x70] sm:$0xff] }
  0x34   :  { %2402 = vmatprep.subr.mxu0 %v3155_v0  ;;  %2437 = vmatprep.subr.mxu1 %v3155_v0  ;;  %v94_v3 = vld [vmem:[#allocation5 + $0x68] sm:$0xff]  ;;  %v3225_v4 = vand.u32 4294901760, %v96_v1  ;;  %v3227_v5 = vand.u32 4294901760, %v95_v2  ;;  %v93_v7 = vld [vmem:[#allocation5 + $0x60] sm:$0xff]  ;;  %v92_v8 = vld [vmem:[#allocation5 + $0x58] sm:$0xff]  ;;  %s3157_s23 = smov [#allocation10]  }
  0x35   :  { %2434 = vmatprep.mubr.msk.f32.mxu0 %vm3156_vm0, %v3155_v0  ;;  %2469 = vmatprep.mubr.msk.f32.mxu1 %vm3156_vm0, %v3155_v0  ;;  %v3229_v6 = vand.u32 4294901760, %v94_v3  ;;  %v91_v9 = vld [vmem:[#allocation5 + $0x50] sm:$0xff]  ;;  %v3231_v10 = vand.u32 4294901760, %v93_v7  ;;  %v3233_v11 = vand.u32 4294901760, %v92_v8  ;;  %v90_v13 = vld [vmem:[#allocation5 + $0x48] sm:$0xff]  ;;  %v89_v14 = vld [vmem:[#allocation5 + $0x40] sm:$0xff] }
  0x36   :  { %v3235_v12 = vand.u32 4294901760, %v91_v9  ;;  %2403 = vmatpush3.msra.mxu0 %v3225_v4  ;;  %v3239_v15 = vsub.f32 %v96_v1, %v3225_v4  ;;  %v3242_v16 = vsub.f32 %v95_v2, %v3227_v5  ;;  %v3244_v17 = vand.u32 4294901760, %v90_v13  ;;  %v88_v19 = vld [vmem:[#allocation5 + $0x38] sm:$0xff]  ;;  %v87_v26 = vld [vmem:[#allocation5 + $0x30] sm:$0xff]  ;;  %v86_v36 = vld [vmem:[#allocation5 + $0x28] sm:$0xff]  ;;  %s2082_s24 = sshll.u32 %s3157_s23, 4  ;;  %s2083_s24 = int_to_ptr.vmem [resolvable:$true] %s2082_s24 }
  0x37   :  { %v3247_v18 = vsub.f32 %v94_v3, %v3229_v6  ;;  %2404 = vmatprep.subr.mxu0 %v3155_v0  ;;  %v3251_v20 = vsub.f32 %v93_v7, %v3231_v10  ;;  %v3254_v21 = vsub.f32 %v92_v8, %v3233_v11  ;;  %v3260_v25 = vand.u32 4294901760, %v89_v14  ;;  %v85_v41 = vld [vmem:[#allocation5 + $0x20] sm:$0xff]  ;;  %v84_v49 = vld [vmem:[#allocation5 + $0x18] sm:$0xff]  ;;  %v83_v54 = vld [vmem:[#allocation5 + $0x10] sm:$0xff]  ;;  %s3121_s25 = scalar_lea.vmem %s2083_s24, 128  ;;  %p3126_p7 = scmp.lt.s32.totalorder %s2083_s24, %s2083_s24 }
  0x38   :  { %2405 = vmatpush3.msra.mxu0 %v3227_v5  ;;  %v198_v22 = vand.u32 4294901760, %v3239_v15  ;;  %v205_v23 = vand.u32 4294901760, %v3242_v16  ;;  %v3264_v28 = vand.u32 4294901760, %v88_v19  ;;  %v3268_v30 = vsub.f32 %v91_v9, %v3235_v12  ;;  %v80_v50 = vld [vmem:[#allocation2] sm:$0xff]  ;;  %v82_v60 = vld [vmem:[#allocation5 + $0x8] sm:$0xff]  ;;  %v81_v7 = vld [vmem:[#allocation5] sm:$0xff]  ;;  %p3122_p6 = scmp.ne.s32.totalorder %s2083_s24, %s3121_s25  ;;  %p3127_p8 = scmp.lt.s32.totalorder %s3121_s25, %s3121_s25 }
  0x39   :  { %v212_v24 = vand.u32 4294901760, %v3247_v18  ;;  %2406 = vmatprep.subr.mxu0 %v3155_v0  ;;  %v219_v27 = vand.u32 4294901760, %v3251_v20  ;;  %v226_v29 = vand.u32 4294901760, %v3254_v21  ;;  %v3281_v34 = vsub.f32 %v90_v13, %v3244_v17 }
  0x3a   :  { %2407 = vmatpush3.msra.mxu0 %v3229_v6  ;;  %v199_v31 = vsub.f32 %v3239_v15, %v198_v22  ;;  %v206_v32 = vsub.f32 %v3242_v16, %v205_v23  ;;  %v3284_v35 = vand.u32 4294901760, %v87_v26  ;;  %v233_v40 = vand.u32 4294901760, %v3268_v30  ;;  %p3128_p9 = por %p3127_p8, %p3126_p7 }
  0x3b   :  { %v213_v33 = vsub.f32 %v3247_v18, %v212_v24  ;;  %2408 = vmatprep.subr.mxu0 %v3155_v0  ;;  %v220_v39 = vsub.f32 %v3251_v20, %v219_v27  ;;  %v227_v42 = vsub.f32 %v3254_v21, %v226_v29  ;;  %v3296_v43 = vsub.f32 %v89_v14, %v3260_v25 }
  0x3c   :  { %2409 = vmatpush3.msra.mxu0 %v3231_v10  ;;  %v200_v37 = vand.u32 4294901760, %v199_v31  ;;  %v207_v38 = vand.u32 4294901760, %v206_v32  ;;  %v3299_v45 = vand.u32 4294901760, %v86_v36  ;;  %v240_v46 = vand.u32 4294901760, %v3281_v34  ;;  %p3129_p10 = pnand %p3128_p9, %p3122_p6 }
  0x3d   :  { %2410 = vmatprep.subr.mxu0 %v3155_v0  ;;  %v214_v44 = vand.u32 4294901760, %v213_v33  ;;  %v3303_v47 = vsub.f32 %v88_v19, %v3264_v28  ;;  %v3307_v48 = vand.u32 4294901760, %v85_v41  ;;  %v221_v51 = vand.u32 4294901760, %v220_v39 }
  0x3e   :  { %2411 = vmatpush3.msra.mxu0 %v3233_v11  ;;  %2438 = vmatpush3.msra.mxu1 %v200_v37  ;;  %v234_v52 = vsub.f32 %v3268_v30, %v233_v40  ;;  %v247_v53 = vand.u32 4294901760, %v3296_v43  ;;  %v3315_v55 = vsub.f32 %v87_v26, %v3284_v35  ;;  %v228_v56 = vand.u32 4294901760, %v227_v42 }
  0x3f   :  { %2412 = vmatprep.subr.mxu0 %v3155_v0  ;;  %2439 = vmatprep.subr.mxu1 %v3155_v0  ;;  %v254_v57 = vand.u32 4294901760, %v3303_v47  ;;  %v241_v58 = vsub.f32 %v3281_v34, %v240_v46  ;;  %v3324_v59 = vand.u32 4294901760, %v84_v49  ;;  %v3327_v61 = vsub.f32 %v86_v36, %v3299_v45 }
  0x40   :  { %2413 = vmatpush3.msra.mxu0 %v3235_v12  ;;  %2440 = vmatpush3.msra.mxu1 %v207_v38  ;;  %v3329_v62 = vand.u32 4294901760, %v80_v50  ;;  %v3333_v63 = vand.u32 4294901760, %v83_v54  ;;  %v235_v1 = vand.u32 4294901760, %v234_v52  ;;  %v248_v2 = vsub.f32 %v3296_v43, %v247_v53 }
  0x41   :  { %2414 = vmatprep.subr.mxu0 %v3155_v0  ;;  %2441 = vmatprep.subr.mxu1 %v3155_v0  ;;  %v261_v3 = vand.u32 4294901760, %v3315_v55  ;;  %v3341_v8 = vsub.f32 %v85_v41, %v3307_v48  ;;  %v255_v9 = vsub.f32 %v3303_v47, %v254_v57  ;;  %v3348_v13 = vand.u32 4294901760, %v82_v60 }
  0x42   :  { %2415 = vmatpush3.msra.mxu0 %v3244_v17  ;;  %2442 = vmatpush3.msra.mxu1 %v214_v44  ;;  %v242_v14 = vand.u32 4294901760, %v241_v58  ;;  %v268_v19 = vand.u32 4294901760, %v3327_v61  ;;  %v3353_v26 = vsub.f32 %v80_v50, %v3329_v62  ;;  %v3356_v31 = vsub.f32 %v84_v49, %v3324_v59 }
  0x43   :  { %2416 = vmatprep.subr.mxu0 %v3155_v0  ;;  %2443 = vmatprep.subr.mxu1 %v3155_v0  ;;  %v3360_v32 = vand.u32 4294901760, %v81_v7  ;;  %v249_v33 = vand.u32 4294901760, %v248_v2  ;;  %v262_v36 = vsub.f32 %v3315_v55, %v261_v3  ;;  %v275_v37 = vand.u32 4294901760, %v3341_v8 }
  0x44   :  { %2417 = vmatpush3.msra.mxu0 %v3260_v25  ;;  %2444 = vmatpush3.msra.mxu1 %v221_v51  ;;  %v3368_v38 = vsub.f32 %v83_v54, %v3333_v63  ;;  %v256_v39 = vand.u32 4294901760, %v255_v9  ;;  %v269_v41 = vsub.f32 %v3327_v61, %v268_v19  ;;  %v187_v42 = vand.u32 4294901760, %v3353_v26 }
  0x45   :  { %2418 = vmatprep.subr.mxu0 %v3155_v0  ;;  %2445 = vmatprep.subr.mxu1 %v3155_v0  ;;  %v282_v44 = vand.u32 4294901760, %v3356_v31  ;;  %v3379_v49 = vsub.f32 %v82_v60, %v3348_v13  ;;  %v263_v50 = vand.u32 4294901760, %v262_v36  ;;  %v276_v51 = vsub.f32 %v3341_v8, %v275_v37 }
  0x46   :  { %2419 = vmatpush3.msra.mxu0 %v3264_v28  ;;  %2446 = vmatpush3.msra.mxu1 %v228_v56  ;;  %v289_v52 = vand.u32 4294901760, %v3368_v38  ;;  %v3389_v54 = vsub.f32 %v81_v7, %v3360_v32  ;;  %v270_v56 = vand.u32 4294901760, %v269_v41  ;;  %v188_v58 = vsub.f32 %v3353_v26, %v187_v42 }
  0x47   :  { %2420 = vmatprep.subr.mxu0 %v3155_v0  ;;  %2447 = vmatprep.subr.mxu1 %v3155_v0  ;;  %v283_v60 = vsub.f32 %v3356_v31, %v282_v44  ;;  %v277_v2 = vand.u32 4294901760, %v276_v51 }
  0x48   :  { %2421 = vmatpush3.msra.mxu0 %v3284_v35  ;;  %2448 = vmatpush3.msra.mxu1 %v235_v1  ;;  %v296_v1 = vand.u32 4294901760, %v3379_v49  ;;  %v290_v7 = vsub.f32 %v3368_v38, %v289_v52  ;;  %v303_v9 = vand.u32 4294901760, %v3389_v54 }
  0x49   :  { %2422 = vmatprep.subr.mxu0 %v3155_v0  ;;  %2449 = vmatprep.subr.mxu1 %v3155_v0 }
  0x4a   :  { %2423 = vmatpush3.msra.mxu0 %v3299_v45  ;;  %2450 = vmatpush3.msra.mxu1 %v242_v14  ;;  %v189_v14 = vand.u32 4294901760, %v188_v58  ;;  %v297_v36 = vsub.f32 %v3379_v49, %v296_v1  ;;  %v304_v41 = vsub.f32 %v3389_v54, %v303_v9  ;;  %v752_v58 = vld [vmem:[#allocation7 + $0x30] sm:$0xff] }
  0x4b   :  { %2424 = vmatprep.subr.mxu0 %v3155_v0  ;;  %2451 = vmatprep.subr.mxu1 %v3155_v0 }
  0x4c   :  { %2425 = vmatpush3.msra.mxu0 %v3307_v48  ;;  %2452 = vmatpush3.msra.mxu1 %v249_v33  ;;  %v284_v33 = vand.u32 4294901760, %v283_v60  ;;  %v305_v51 = vand.u32 4294901760, %v304_v41 }
  0x4d   :  { %2426 = vmatprep.subr.mxu0 %v3155_v0  ;;  %2453 = vmatprep.subr.mxu1 %v3155_v0 }
  0x4e   :  { %2427 = vmatpush3.msra.mxu0 %v3324_v59  ;;  %2454 = vmatpush3.msra.mxu1 %v256_v39  ;;  %v291_v39 = vand.u32 4294901760, %v290_v7  ;;  %v751_v7 = vld [vmem:[#allocation7 + $0x28] sm:$0xff] }
  0x4f   :  { %2428 = vmatprep.subr.mxu0 %v3155_v0  ;;  %2455 = vmatprep.subr.mxu1 %v3155_v0 }
  0x50   :  { %2429 = vmatpush3.msra.mxu0 %v3333_v63  ;;  %2456 = vmatpush3.msra.mxu1 %v263_v50  ;;  %v298_v50 = vand.u32 4294901760, %v297_v36  ;;  %v750_v36 = vld [vmem:[#allocation7 + $0x20] sm:$0xff] }
  0x51   :  { %2430 = vmatprep.subr.mxu0 %v3155_v0  ;;  %2457 = vmatprep.subr.mxu1 %v3155_v0 }
  0x52   :  { %2431 = vmatpush3.msra.mxu0 %v3348_v13  ;;  %2458 = vmatpush3.msra.mxu1 %v270_v56 }
  0x53   :  { %2432 = vmatprep.subr.mxu0 %v3155_v0  ;;  %2459 = vmatprep.subr.mxu1 %v3155_v0 }
  0x54   :  { %2433 = vmatpush3.msra.mxu0 %v3360_v32  ;;  %2460 = vmatpush3.msra.mxu1 %v277_v2  ;;  %v3688_v2 = vand.u32 4294901760, %v752_v58 }
  0x55   :  { %2461 = vmatprep.subr.mxu1 %v3155_v0  ;;  %2472 = vmatprep.subr.mxu0 %v3155_v0 }
  0x56   :  { %2435 = vmatmul.mubr.f32.vlgmr.msra.gmra.mxu0 %v189_v14  ;;  %2462 = vmatpush3.msra.mxu1 %v284_v33  ;;  %v3694_v14 = vsub.f32 %v752_v58, %v3688_v2  ;;  %v3696_v33 = vand.u32 4294901760, %v751_v7 }
  0x57   :  { %2473 = vmatpush3.msra.mxu0 %v3239_v15  ;;  %2463 = vmatprep.subr.mxu1 %v3155_v0  ;;  %v758_v15 = vld [vmem:[#allocation7 + $0x60] sm:$0xff] }
  0x58   :  { %2474 = vmatprep.subr.mxu0 %v3155_v0  ;;  %2464 = vmatpush3.msra.mxu1 %v291_v39  ;;  %v926_v41 = vand.u32 4294901760, %v3694_v14 }
  0x59   :  { %2475 = vmatpush3.msra.mxu0 %v3242_v16  ;;  %2465 = vmatprep.subr.mxu1 %v3155_v0  ;;  %v757_v16 = vld [vmem:[#allocation7 + $0x58] sm:$0xff] }
  0x5a   :  { %2476 = vmatprep.subr.mxu0 %v3155_v0  ;;  %2466 = vmatpush3.msra.mxu1 %v298_v50  ;;  %v3703_v50 = vsub.f32 %v751_v7, %v3696_v33 }
  0x5b   :  { %2477 = vmatpush3.msra.mxu0 %v3247_v18  ;;  %2467 = vmatprep.subr.mxu1 %v3155_v0 }
  0x5c   :  { %2478 = vmatprep.subr.mxu0 %v3155_v0  ;;  %2468 = vmatpush3.msra.mxu1 %v305_v51  ;;  %v3705_v51 = vand.u32 4294901760, %v750_v36 }
  0x5d   :  { %2479 = vmatpush3.msra.mxu0 %v3251_v20  ;;  %2470 = vmatmul.mubr.f32.vlgmr.msra.gmra.mxu1 %v3329_v62 }
  0x5e   :  { %2480 = vmatprep.subr.mxu0 %v3155_v0  ;;  %2507 = vmatprep.subr.mxu1 %v3155_v0 }
  0x5f   :  { %2481 = vmatpush3.msra.mxu0 %v3254_v21  ;;  %2508 = vmatpush3.msra.mxu1 %v3225_v4  ;;  %v3603_v21 = vand.u32 4294901760, %v758_v15 }
  0x60   :  { %2482 = vmatprep.subr.mxu0 %v3155_v0  ;;  %2509 = vmatprep.subr.mxu1 %v3155_v0 }
  0x61   :  { %2483 = vmatpush3.msra.mxu0 %v3268_v30  ;;  %2510 = vmatpush3.msra.mxu1 %v3227_v5 }
  0x62   :  { %2484 = vmatprep.subr.mxu0 %v3155_v0  ;;  %2511 = vmatprep.subr.mxu1 %v3155_v0 }
  0x63   :  { %2485 = vmatpush3.msra.mxu0 %v3281_v34  ;;  %2512 = vmatpush3.msra.mxu1 %v3229_v6 }
  0x64   :  { %2486 = vmatprep.subr.mxu0 %v3155_v0  ;;  %2513 = vmatprep.subr.mxu1 %v3155_v0 }
  0x65   :  { %2487 = vmatpush3.msra.mxu0 %v3296_v43  ;;  %2514 = vmatpush3.msra.mxu1 %v3231_v10 }
  0x66   :  { %2488 = vmatprep.subr.mxu0 %v3155_v0  ;;  %2515 = vmatprep.subr.mxu1 %v3155_v0 }
  0x67   :  { %2489 = vmatpush3.msra.mxu0 %v3303_v47  ;;  %2516 = vmatpush3.msra.mxu1 %v3233_v11 }
  0x68   :  { %2490 = vmatprep.subr.mxu0 %v3155_v0  ;;  %2517 = vmatprep.subr.mxu1 %v3155_v0 }
  0x69   :  { %2491 = vmatpush3.msra.mxu0 %v3315_v55  ;;  %2518 = vmatpush3.msra.mxu1 %v3235_v12 }
  0x6a   :  { %2492 = vmatprep.subr.mxu0 %v3155_v0  ;;  %2519 = vmatprep.subr.mxu1 %v3155_v0 }
  0x6b   :  { %2493 = vmatpush3.msra.mxu0 %v3327_v61  ;;  %2520 = vmatpush3.msra.mxu1 %v3244_v17 }
  0x6c   :  { %2494 = vmatprep.subr.mxu0 %v3155_v0  ;;  %2521 = vmatprep.subr.mxu1 %v3155_v0 }
  0x6d   :  { %2495 = vmatpush3.msra.mxu0 %v3341_v8  ;;  %2522 = vmatpush3.msra.mxu1 %v3260_v25 }
  0x6e   :  { %2496 = vmatprep.subr.mxu0 %v3155_v0  ;;  %2523 = vmatprep.subr.mxu1 %v3155_v0 }
  0x6f   :  { %2497 = vmatpush3.msra.mxu0 %v3356_v31  ;;  %2524 = vmatpush3.msra.mxu1 %v3264_v28 }
  0x70   :  { %2498 = vmatprep.subr.mxu0 %v3155_v0  ;;  %2525 = vmatprep.subr.mxu1 %v3155_v0 }
  0x71   :  { %2499 = vmatpush3.msra.mxu0 %v3368_v38  ;;  %2526 = vmatpush3.msra.mxu1 %v3284_v35 }
  0x72   :  { %2500 = vmatprep.subr.mxu0 %v3155_v0  ;;  %2527 = vmatprep.subr.mxu1 %v3155_v0 }
  0x73   :  { %2501 = vmatpush3.msra.mxu0 %v3379_v49  ;;  %2528 = vmatpush3.msra.mxu1 %v3299_v45 }
  0x74   :  { %2502 = vmatprep.subr.mxu0 %v3155_v0  ;;  %2529 = vmatprep.subr.mxu1 %v3155_v0 }
  0x75   :  { %2503 = vmatpush3.msra.mxu0 %v3389_v54  ;;  %2504 = vmatprep.mubr.msk.f32.mxu0 %vm3156_vm0, %v3155_v0 }
  0x76   :  { %2530 = vmatpush3.msra.mxu1 %v3307_v48  ;;  %2505 = vmatmul.mubr.f32.vlgmr.msra.gmra.mxu0 %v3353_v26 }
  0x77   :  { %2531 = vmatprep.subr.mxu1 %v3155_v0  ;;  %2542 = vmatprep.subr.mxu0 %v3155_v0 }
  0x78   :  { %2532 = vmatpush3.msra.mxu1 %v3324_v59  ;;  %2543 = vmatpush3.msra.mxu0 %v198_v22  ;;  %v756_v22 = vld [vmem:[#allocation7 + $0x50] sm:$0xff] }
  0x79   :  { %2533 = vmatprep.subr.mxu1 %v3155_v0  ;;  %2544 = vmatprep.subr.mxu0 %v3155_v0 }
  0x7a   :  { %2534 = vmatpush3.msra.mxu1 %v3333_v63  ;;  %2545 = vmatpush3.msra.mxu0 %v205_v23  ;;  %v755_v23 = vld [vmem:[#allocation7 + $0x48] sm:$0xff] }
  0x7b   :  { %2535 = vmatprep.subr.mxu1 %v3155_v0  ;;  %2546 = vmatprep.subr.mxu0 %v3155_v0 }
  0x7c   :  { %2536 = vmatpush3.msra.mxu1 %v3348_v13  ;;  %2547 = vmatpush3.msra.mxu0 %v212_v24  ;;  %v754_v24 = vld [vmem:[#allocation7 + $0x40] sm:$0xff] }
  0x7d   :  { %2537 = vmatprep.subr.mxu1 %v3155_v0  ;;  %2548 = vmatprep.subr.mxu0 %v3155_v0 }
  0x7e   :  { %2538 = vmatpush3.msra.mxu1 %v3360_v32  ;;  %2539 = vmatprep.mubr.msk.f32.mxu1 %vm3156_vm0, %v3155_v0 }
  0x7f   :  { %2549 = vmatpush3.msra.mxu0 %v219_v27  ;;  %2540 = vmatmul.mubr.f32.vlgmr.msra.gmra.mxu1 %v187_v42  ;;  %v3608_v27 = vand.u32 4294901760, %v756_v22 }
  0x80   :  { %2550 = vmatprep.subr.mxu0 %v3155_v0  ;;  %2577 = vmatprep.subr.mxu1 %v3155_v0 }
  0x81   :  { %2551 = vmatpush3.msra.mxu0 %v226_v29  ;;  %2578 = vmatpush3.msra.mxu1 %v3225_v4  ;;  %v761_v4 = vld [vmem:[#allocation7 + $0x78] sm:$0xff]  ;;  %v3613_v29 = vand.u32 4294901760, %v754_v24 }
  0x82   :  { %2552 = vmatprep.subr.mxu0 %v3155_v0  ;;  %2579 = vmatprep.subr.mxu1 %v3155_v0 }
  0x83   :  { %2553 = vmatpush3.msra.mxu0 %v233_v40  ;;  %2580 = vmatpush3.msra.mxu1 %v3227_v5  ;;  %v3588_v5 = vand.u32 4294901760, %v761_v4  ;;  %v3623_v40 = vsub.f32 %v758_v15, %v3603_v21  ;;  %v3637_v47 = vsub.f32 %v754_v24, %v3613_v29  ;;  %v3715_v15 = vsub.f32 %v750_v36, %v3705_v51 }
  0x84   :  { %2554 = vmatprep.subr.mxu0 %v3155_v0  ;;  %2581 = vmatprep.subr.mxu1 %v3155_v0 }
  0x85   :  { %2555 = vmatpush3.msra.mxu0 %v240_v46  ;;  %2582 = vmatpush3.msra.mxu1 %v3229_v6  ;;  %v760_v6 = vld [vmem:[#allocation7 + $0x70] sm:$0xff]  ;;  %v912_v31 = vand.u32 4294901760, %v3637_v47 }
  0x86   :  { %2556 = vmatprep.subr.mxu0 %v3155_v0  ;;  %2583 = vmatprep.subr.mxu1 %v3155_v0 }
  0x87   :  { %2557 = vmatpush3.msra.mxu0 %v247_v53  ;;  %2584 = vmatpush3.msra.mxu1 %v3231_v10  ;;  %v3591_v10 = vsub.f32 %v761_v4, %v3588_v5  ;;  %v913_v56 = vsub.f32 %v3637_v47, %v912_v31  ;;  %v749_v4 = vld [vmem:[#allocation7 + $0x18] sm:$0xff] }
  0x88   :  { %2558 = vmatprep.subr.mxu0 %v3155_v0  ;;  %2585 = vmatprep.subr.mxu1 %v3155_v0 }
  0x89   :  { %2559 = vmatpush3.msra.mxu0 %v254_v57  ;;  %2586 = vmatpush3.msra.mxu1 %v3233_v11  ;;  %v3593_v11 = vand.u32 4294901760, %v760_v6 }
  0x8a   :  { %2560 = vmatprep.subr.mxu0 %v3155_v0  ;;  %2587 = vmatprep.subr.mxu1 %v3155_v0 }
  0x8b   :  { %2561 = vmatpush3.msra.mxu0 %v261_v3  ;;  %2588 = vmatpush3.msra.mxu1 %v3235_v12  ;;  %v759_v12 = vld [vmem:[#allocation7 + $0x68] sm:$0xff]  ;;  %v3599_v18 = vsub.f32 %v760_v6, %v3593_v11  ;;  %v927_v6 = vsub.f32 %v3694_v14, %v926_v41 }
  0x8c   :  { %2562 = vmatprep.subr.mxu0 %v3155_v0  ;;  %2589 = vmatprep.subr.mxu1 %v3155_v0  ;;  %v3601_v20 = vand.u32 4294901760, %v759_v12 }
  0x8d   :  { %2563 = vmatpush3.msra.mxu0 %v268_v19  ;;  %2590 = vmatpush3.msra.mxu1 %v3244_v17  ;;  %v863_v17 = vand.u32 4294901760, %v3591_v10  ;;  %v870_v34 = vand.u32 4294901760, %v3599_v18 }
  0x8e   :  { %2564 = vmatprep.subr.mxu0 %v3155_v0  ;;  %2591 = vmatprep.subr.mxu1 %v3155_v0 }
  0x8f   :  { %2565 = vmatpush3.msra.mxu0 %v275_v37  ;;  %2592 = vmatpush3.msra.mxu1 %v3260_v25  ;;  %v3606_v25 = vand.u32 4294901760, %v757_v16  ;;  %v864_v30 = vsub.f32 %v3591_v10, %v863_v17  ;;  %v871_v55 = vsub.f32 %v3599_v18, %v870_v34 }
  0x90   :  { %2566 = vmatprep.subr.mxu0 %v3155_v0  ;;  %2593 = vmatprep.subr.mxu1 %v3155_v0 }
  0x91   :  { %2567 = vmatpush3.msra.mxu0 %v282_v44  ;;  %2594 = vmatpush3.msra.mxu1 %v3264_v28  ;;  %v3611_v28 = vand.u32 4294901760, %v755_v23  ;;  %v3627_v43 = vsub.f32 %v757_v16, %v3606_v25  ;;  %v865_v53 = vand.u32 4294901760, %v864_v30  ;;  %v872_v3 = vand.u32 4294901760, %v871_v55  ;;  %v747_v55 = vld [vmem:[#allocation7 + $0x8] sm:$0xff] }
  0x92   :  { %2568 = vmatprep.subr.mxu0 %v3155_v0  ;;  %2595 = vmatprep.subr.mxu1 %v3155_v0  ;;  %v3717_v16 = vand.u32 4294901760, %v749_v4  ;;  %v940_v30 = vand.u32 4294901760, %v3715_v15 }
  0x93   :  { %2569 = vmatpush3.msra.mxu0 %v289_v52  ;;  %2596 = vmatpush3.msra.mxu1 %v3284_v35  ;;  %v3620_v35 = vsub.f32 %v759_v12, %v3601_v20  ;;  %v3633_v46 = vsub.f32 %v755_v23, %v3611_v28  ;;  %v891_v61 = vand.u32 4294901760, %v3627_v43  ;;  %v933_v12 = vand.u32 4294901760, %v3703_v50 }
  0x94   :  { %2570 = vmatprep.subr.mxu0 %v3155_v0  ;;  %2597 = vmatprep.subr.mxu1 %v3155_v0  ;;  %v928_v23 = vand.u32 4294901760, %v927_v6 }
  0x95   :  { %2571 = vmatpush3.msra.mxu0 %v296_v1  ;;  %2598 = vmatpush3.msra.mxu1 %v3299_v45  ;;  %v3630_v45 = vsub.f32 %v756_v22, %v3608_v27  ;;  %v877_v57 = vand.u32 4294901760, %v3620_v35  ;;  %v892_v26 = vsub.f32 %v3627_v43, %v891_v61  ;;  %v748_v22 = vld [vmem:[#allocation7 + $0x10] sm:$0xff]  ;;  %v934_v24 = vsub.f32 %v3703_v50, %v933_v12 }
  0x96   :  { %2572 = vmatprep.subr.mxu0 %v3155_v0  ;;  %2599 = vmatprep.subr.mxu1 %v3155_v0 }
  0x97   :  { %2573 = vmatpush3.msra.mxu0 %v303_v9  ;;  %2574 = vmatprep.mubr.msk.f32.mxu0 %vm3156_vm0, %v3155_v0  ;;  %v878_v8 = vsub.f32 %v3620_v35, %v877_v57  ;;  %v893_v44 = vand.u32 4294901760, %v892_v26  ;;  %v914_v9 = vand.u32 4294901760, %v913_v56  ;;  %v3738_v26 = vand.u32 4294901760, %v747_v55 }
  0x98   :  { %2600 = vmatpush3.msra.mxu1 %v3307_v48  ;;  %2575 = vmatmul.mubr.f32.vlgmr.msra.gmra.mxu0 %v3329_v62  ;;  %v753_v48 = vld [vmem:[#allocation7 + $0x38] sm:$0xff] }
  0x99   :  { %2601 = vmatprep.subr.mxu1 %v3155_v0  ;;  %2609 = vmatprep.mubr.msk.f32.mxu1 %vm3156_vm0, %v3155_v0  ;;  %v3656_v19 = vand.u32 4294901760, %v753_v48 }
  0x9a   :  { %2602 = vmatpush3.msra.mxu1 %v3324_v59  ;;  %2612 = vmatprep.subr.mxu0 %v3155_v0  ;;  %v884_v59 = vand.u32 4294901760, %v3623_v40 }
  0x9b   :  { %2603 = vmatprep.subr.mxu1 %v3155_v0  ;;  %2644 = vmatprep.mubr.msk.f32.mxu0 %vm3156_vm0, %v3155_v0  ;;  %v3667_v42 = vsub.f32 %v753_v48, %v3656_v19  ;;  %v3727_v48 = vsub.f32 %v749_v4, %v3717_v16 }
  0x9c   :  { %2604 = vmatpush3.msra.mxu1 %v3333_v63  ;;  %2613 = vmatpush3.msra.mxu0 %v3588_v5  ;;  %v905_v63 = vand.u32 4294901760, %v3633_v46 }
  0x9d   :  { %2605 = vmatprep.subr.mxu1 %v3155_v0  ;;  %2614 = vmatprep.subr.mxu0 %v3155_v0  ;;  %v919_v52 = vand.u32 4294901760, %v3667_v42 }
  0x9e   :  { %2606 = vmatpush3.msra.mxu1 %v3348_v13  ;;  %2615 = vmatpush3.msra.mxu0 %v3593_v11  ;;  %v885_v13 = vsub.f32 %v3623_v40, %v884_v59  ;;  %v906_v49 = vsub.f32 %v3633_v46, %v905_v63 }
  0x9f   :  { %2607 = vmatprep.subr.mxu1 %v3155_v0  ;;  %2616 = vmatprep.subr.mxu0 %v3155_v0  ;;  %v920_v1 = vsub.f32 %v3667_v42, %v919_v52 }
  0xa0   :  { %2608 = vmatpush3.msra.mxu1 %v3360_v32  ;;  %2617 = vmatpush3.msra.mxu0 %v3601_v20  ;;  %v879_v32 = vand.u32 4294901760, %v878_v8  ;;  %v886_v37 = vand.u32 4294901760, %v885_v13  ;;  %v907_v60 = vand.u32 4294901760, %v906_v49  ;;  %v941_v8 = vsub.f32 %v3715_v15, %v940_v30 }
  0xa1   :  { %2610 = vmatmul.mubr.f32.vlgmr.msra.gmra.mxu1 %v3329_v62  ;;  %2647 = vmatprep.subr.mxu1 %v3155_v0  ;;  %v898_v62 = vand.u32 4294901760, %v3630_v45  ;;  %v921_v39 = vand.u32 4294901760, %v920_v1  ;;  %v4323_v13 = vand.u32 4294901760, %v3727_v48  ;;  %v3750_v49 = vsub.f32 %v747_v55, %v3738_v26 }
  0xa2   :  { %2679 = vmatprep.mubr.msk.f32.mxu1 %vm3156_vm0, %v3155_v0  ;;  %2618 = vmatprep.subr.mxu0 %v3155_v0 }
  0xa3   :  { %2619 = vmatpush3.msra.mxu0 %v3603_v21  ;;  %2648 = vmatpush3.msra.mxu1 %v865_v53  ;;  %v899_v38 = vsub.f32 %v3630_v45, %v898_v62  ;;  %v3731_v53 = vand.u32 4294901760, %v748_v22 }
  0xa4   :  { %2620 = vmatprep.subr.mxu0 %v3155_v0  ;;  %2649 = vmatprep.subr.mxu1 %v3155_v0 }
  0xa5   :  { %2621 = vmatpush3.msra.mxu0 %v3606_v25  ;;  %2650 = vmatpush3.msra.mxu1 %v872_v3  ;;  %v900_v54 = vand.u32 4294901760, %v899_v38  ;;  %v935_v3 = vand.u32 4294901760, %v934_v24  ;;  %v942_v38 = vand.u32 4294901760, %v941_v8 }
  0xa6   :  { %2622 = vmatprep.subr.mxu0 %v3155_v0  ;;  %2651 = vmatprep.subr.mxu1 %v3155_v0 }
  0xa7   :  { %2623 = vmatpush3.msra.mxu0 %v3608_v27  ;;  %2652 = vmatpush3.msra.mxu1 %v879_v32  ;;  %v3743_v32 = vsub.f32 %v748_v22, %v3731_v53 }
  0xa8   :  { %2624 = vmatprep.subr.mxu0 %v3155_v0  ;;  %2653 = vmatprep.subr.mxu1 %v3155_v0 }
  0xa9   :  { %2625 = vmatpush3.msra.mxu0 %v3611_v28  ;;  %2654 = vmatpush3.msra.mxu1 %v886_v37  ;;  %v746_v37 = vld [vmem:[#allocation7] sm:$0xff]  ;;  %v4322_v56 = vand.u32 4294901760, %v3743_v32 }
  0xaa   :  { %2626 = vmatprep.subr.mxu0 %v3155_v0  ;;  %2655 = vmatprep.subr.mxu1 %v3155_v0 }
  0xab   :  { %2627 = vmatpush3.msra.mxu0 %v3613_v29  ;;  %2656 = vmatpush3.msra.mxu1 %v893_v44  ;;  %v948_v44 = vsub.f32 %v3727_v48, %v4323_v13  ;;  %v955_v7 = vsub.f32 %v3743_v32, %v4322_v56 }
  0xac   :  { %2628 = vmatprep.subr.mxu0 %v3155_v0  ;;  %2657 = vmatprep.subr.mxu1 %v3155_v0 }
  0xad   :  { %2629 = vmatpush3.msra.mxu0 %v3656_v19  ;;  %2658 = vmatpush3.msra.mxu1 %v900_v54  ;;  %v3752_v54 = vand.u32 4294901760, %v746_v37  ;;  %v949_v58 = vand.u32 4294901760, %v948_v44 }
  0xae   :  { %2630 = vmatprep.subr.mxu0 %v3155_v0  ;;  %2659 = vmatprep.subr.mxu1 %v3155_v0 }
  0xaf   :  { %2631 = vmatpush3.msra.mxu0 %v3688_v2  ;;  %2660 = vmatpush3.msra.mxu1 %v907_v60  ;;  %v4321_v60 = vand.u32 4294901760, %v3750_v49  ;;  %v3760_v1 = vsub.f32 %v746_v37, %v3752_v54 }
  0xb0   :  { %2632 = vmatprep.subr.mxu0 %v3155_v0  ;;  %2661 = vmatprep.subr.mxu1 %v3155_v0 }
  0xb1   :  { %2633 = vmatpush3.msra.mxu0 %v3696_v33  ;;  %2662 = vmatpush3.msra.mxu1 %v914_v9  ;;  %v962_v9 = vsub.f32 %v3750_v49, %v4321_v60  ;;  %v4320_v36 = vand.u32 4294901760, %v3760_v1 }
  0xb2   :  { %2634 = vmatprep.subr.mxu0 %v3155_v0  ;;  %2663 = vmatprep.subr.mxu1 %v3155_v0 }
  0xb3   :  { %2635 = vmatpush3.msra.mxu0 %v3705_v51  ;;  %2664 = vmatpush3.msra.mxu1 %v921_v39  ;;  %v956_v39 = vand.u32 4294901760, %v955_v7  ;;  %v963_v4 = vand.u32 4294901760, %v962_v9  ;;  %v969_v6 = vsub.f32 %v3760_v1, %v4320_v36 }
  0xb4   :  { %2636 = vmatprep.subr.mxu0 %v3155_v0  ;;  %2665 = vmatprep.subr.mxu1 %v3155_v0 }
  0xb5   :  { %2637 = vmatpush3.msra.mxu0 %v3717_v16  ;;  %2666 = vmatpush3.msra.mxu1 %v928_v23  ;;  %v970_v22 = vand.u32 4294901760, %v969_v6 }
  0xb6   :  { %2638 = vmatprep.subr.mxu0 %v3155_v0  ;;  %2667 = vmatprep.subr.mxu1 %v3155_v0 }
  0xb7   :  { %2639 = vmatpush3.msra.mxu0 %v3731_v53  ;;  %2668 = vmatpush3.msra.mxu1 %v935_v3 }
  0xb8   :  { %2640 = vmatprep.subr.mxu0 %v3155_v0  ;;  %2669 = vmatprep.subr.mxu1 %v3155_v0 }
  0xb9   :  { %2641 = vmatpush3.msra.mxu0 %v3738_v26  ;;  %2670 = vmatpush3.msra.mxu1 %v942_v38 }
  0xba   :  { %2642 = vmatprep.subr.mxu0 %v3155_v0  ;;  %2671 = vmatprep.subr.mxu1 %v3155_v0 }
  0xbb   :  { %2643 = vmatpush3.msra.mxu0 %v3752_v54  ;;  %2672 = vmatpush3.msra.mxu1 %v949_v58  ;;  %v2093_v58 = vld [vmem:[%s4314_s2] ss:$0 sm:$0xff] }
  0xbc   :  { %2682 = vmatprep.subr.mxu0 %v3155_v0  ;;  %2673 = vmatprep.subr.mxu1 %v3155_v0 }
  0xbd   :  { %2674 = vmatpush3.msra.mxu1 %v956_v39 }
  0xbe   :  { %2675 = vmatprep.subr.mxu1 %v3155_v0 }
  0xbf   :  { %2676 = vmatpush3.msra.mxu1 %v963_v4 }
  0xc0   :  { %2677 = vmatprep.subr.mxu1 %v3155_v0 }
  0xc1   :  { %2678 = vmatpush3.msra.mxu1 %v970_v22 }
  0xc2   :  { %2717 = vmatprep.subr.mxu1 %v3155_v0 }
 0x116   :  { %v191_v23 = vpop.f32.mrf.mxu0 }
 0x117   :  { %v192_v7 = vadd.f32 %v2093_v58, %v191_v23 }
 0x118   :  { %v2436_v24 = vpop.f32.mrf.mxu0 }
 0x11d   :  { %v342_v55 = vpop.f32.mrf.mxu1 }
 0x11e   :  { %v343_v39 = vadd.f32 %v342_v55, %v192_v7 }
 0x11f   :  { %v2471_v3 = vpop.f32.mrf.mxu1 }
 0x136   :  { %v446_v8 = vpop.f32.mrf.mxu0 }
 0x137   :  { %v447_v6 = vadd.f32 %v446_v8, %v343_v39 }
 0x138   :  { %v2506_v37 = vpop.f32.mrf.mxu0 }
 0x13f   :  { %v535_v38 = vpop.f32.mrf.mxu1 }
 0x140   :  { %v536_v22 = vadd.f32 %v535_v38, %v447_v6  ;;  %v1418_v38 = vld [vmem:[#allocation8 + $0x38] sm:$0xff] }
 0x141   :  { %v2541_v44 = vpop.f32.mrf.mxu1  ;;  %v4039_v7 = vand.u32 4294901760, %v1418_v38 }
 0x158   :  { %v654_v9 = vpop.f32.mrf.mxu0 }
 0x159   :  { %v655_v36 = vadd.f32 %v654_v9, %v536_v22  ;;  %v1417_v9 = vld [vmem:[#allocation8 + $0x30] sm:$0xff]  ;;  %v1416_v22 = vld [vmem:[#allocation8 + $0x28] sm:$0xff] }
 0x15a   :  { %v2576_v4 = vpop.f32.mrf.mxu0  ;;  %v4047_v6 = vand.u32 4294901760, %v1417_v9 }
 0x15b   :  { %v4045_v4 = vsub.f32 %v1418_v38, %v4039_v7 }
 0x161   :  { %v741_v60 = vpop.f32.mrf.mxu1 }
 0x162   :  { %v742_v56 = vadd.f32 %v741_v60, %v655_v36 }
 0x163   :  { %v2611_v24 = vpop.f32.mrf.mxu1 }
 0x164   :  { %v745_v13 = vmax.f32 %v742_v56, 0.0 }
 0x166   :  { %v3783_v3 = vand.u32 4294901760, %v745_v13 }
 0x168   :  { %v3786_v37 = vsub.f32 %v745_v13, %v3783_v3  ;;  %2680 = vmatmul.mubr.f32.vlgmr.msra.gmra.mxu1 %v3783_v3 }
 0x169   :  { %2718 = vmatpush3.msra.mxu1 %v3588_v5  ;;  %2749 = vmatprep.mubr.msk.f32.mxu1 %vm3156_vm0, %v3155_v0 }
 0x16a   :  { %v852_v23 = vand.u32 4294901760, %v3786_v37  ;;  %2719 = vmatprep.subr.mxu1 %v3155_v0 }
 0x16b   :  { %2720 = vmatpush3.msra.mxu1 %v3593_v11 }
 0x16c   :  { %v853_v56 = vsub.f32 %v3786_v37, %v852_v23  ;;  %2721 = vmatprep.subr.mxu1 %v3155_v0 }
 0x16d   :  { %2722 = vmatpush3.msra.mxu1 %v3601_v20 }
 0x16e   :  { %2723 = vmatprep.subr.mxu1 %v3155_v0  ;;  %v854_v13 = vand.u32 4294901760, %v853_v56  ;;  %v1415_v56 = vld [vmem:[#allocation8 + $0x20] sm:$0xff] }
 0x16f   :  { %2724 = vmatpush3.msra.mxu1 %v3603_v21 }
 0x170   :  { %2725 = vmatprep.subr.mxu1 %v3155_v0  ;;  %2645 = vmatmul.mubr.f32.vlgmr.msra.gmra.mxu0 %v854_v13 }
 0x171   :  { %2683 = vmatpush3.msra.mxu0 %v3591_v10  ;;  %2726 = vmatpush3.msra.mxu1 %v3606_v25  ;;  %v4329_v10 = vand.u32 4294901760, %v3743_v32 }
 0x172   :  { %2684 = vmatprep.subr.mxu0 %v3155_v0  ;;  %2727 = vmatprep.subr.mxu1 %v3155_v0 }
 0x173   :  { %2685 = vmatpush3.msra.mxu0 %v3599_v18  ;;  %2728 = vmatpush3.msra.mxu1 %v3608_v27  ;;  %v1426_v18 = vld [vmem:[#allocation8 + $0x78] sm:$0xff] }
 0x174   :  { %2686 = vmatprep.subr.mxu0 %v3155_v0  ;;  %2729 = vmatprep.subr.mxu1 %v3155_v0 }
 0x175   :  { %2687 = vmatpush3.msra.mxu0 %v3620_v35  ;;  %2730 = vmatpush3.msra.mxu1 %v3611_v28 }
 0x176   :  { %2688 = vmatprep.subr.mxu0 %v3155_v0  ;;  %2731 = vmatprep.subr.mxu1 %v3155_v0 }
 0x177   :  { %2689 = vmatpush3.msra.mxu0 %v3623_v40  ;;  %2732 = vmatpush3.msra.mxu1 %v3613_v29 }
 0x178   :  { %2690 = vmatprep.subr.mxu0 %v3155_v0  ;;  %2733 = vmatprep.subr.mxu1 %v3155_v0 }
 0x179   :  { %2691 = vmatpush3.msra.mxu0 %v3627_v43  ;;  %2734 = vmatpush3.msra.mxu1 %v3656_v19 }
 0x17a   :  { %2692 = vmatprep.subr.mxu0 %v3155_v0  ;;  %2735 = vmatprep.subr.mxu1 %v3155_v0 }
 0x17b   :  { %2693 = vmatpush3.msra.mxu0 %v3630_v45  ;;  %2736 = vmatpush3.msra.mxu1 %v3688_v2  ;;  %v1421_v45 = vld [vmem:[#allocation8 + $0x50] sm:$0xff] }
 0x17c   :  { %2694 = vmatprep.subr.mxu0 %v3155_v0  ;;  %2737 = vmatprep.subr.mxu1 %v3155_v0 }
 0x17d   :  { %2695 = vmatpush3.msra.mxu0 %v3633_v46  ;;  %2738 = vmatpush3.msra.mxu1 %v3696_v33  ;;  %v1420_v46 = vld [vmem:[#allocation8 + $0x48] sm:$0xff] }
 0x17e   :  { %2696 = vmatprep.subr.mxu0 %v3155_v0  ;;  %2739 = vmatprep.subr.mxu1 %v3155_v0 }
 0x17f   :  { %2697 = vmatpush3.msra.mxu0 %v3637_v47  ;;  %2740 = vmatpush3.msra.mxu1 %v3705_v51  ;;  %v1419_v47 = vld [vmem:[#allocation8 + $0x40] sm:$0xff] }
 0x180   :  { %2698 = vmatprep.subr.mxu0 %v3155_v0  ;;  %2741 = vmatprep.subr.mxu1 %v3155_v0 }
 0x181   :  { %2699 = vmatpush3.msra.mxu0 %v3667_v42  ;;  %2742 = vmatpush3.msra.mxu1 %v3717_v16  ;;  %v3984_v42 = vand.u32 4294901760, %v1419_v47 }
 0x182   :  { %2700 = vmatprep.subr.mxu0 %v3155_v0  ;;  %2743 = vmatprep.subr.mxu1 %v3155_v0 }
 0x183   :  { %2701 = vmatpush3.msra.mxu0 %v3694_v14  ;;  %2744 = vmatpush3.msra.mxu1 %v3731_v53 }
 0x184   :  { %2702 = vmatprep.subr.mxu0 %v3155_v0  ;;  %2745 = vmatprep.subr.mxu1 %v3155_v0 }
 0x185   :  { %2703 = vmatpush3.msra.mxu0 %v3703_v50  ;;  %2746 = vmatpush3.msra.mxu1 %v3738_v26 }
 0x186   :  { %2704 = vmatprep.subr.mxu0 %v3155_v0  ;;  %2747 = vmatprep.subr.mxu1 %v3155_v0 }
 0x187   :  { %2705 = vmatpush3.msra.mxu0 %v3715_v15  ;;  %2748 = vmatpush3.msra.mxu1 %v3752_v54 }
 0x188   :  { %2706 = vmatprep.subr.mxu0 %v3155_v0  ;;  %2750 = vmatmul.mubr.f32.vlgmr.msra.gmra.mxu1 %v852_v23  ;;  %v4056_v23 = vand.u32 4294901760, %v1416_v22 }
 0x189   :  { %2787 = vmatprep.subr.mxu1 %v3155_v0  ;;  %2707 = vmatpush3.msra.mxu0 %v3727_v48 }
 0x18a   :  { %2788 = vmatpush3.msra.mxu1 %v3588_v5  ;;  %2708 = vmatprep.subr.mxu0 %v3155_v0  ;;  %v4328_v5 = vand.u32 4294901760, %v3727_v48 }
 0x18b   :  { %2789 = vmatprep.subr.mxu1 %v3155_v0  ;;  %2709 = vmatpush3.msra.mxu0 %v3743_v32 }
 0x18c   :  { %2790 = vmatpush3.msra.mxu1 %v3593_v11  ;;  %2710 = vmatprep.subr.mxu0 %v3155_v0  ;;  %v4330_v11 = vand.u32 4294901760, %v3750_v49 }
 0x18d   :  { %2791 = vmatprep.subr.mxu1 %v3155_v0  ;;  %2711 = vmatpush3.msra.mxu0 %v3750_v49 }
 0x18e   :  { %2792 = vmatpush3.msra.mxu1 %v3601_v20  ;;  %2712 = vmatprep.subr.mxu0 %v3155_v0  ;;  %v3950_v20 = vand.u32 4294901760, %v1426_v18 }
 0x18f   :  { %2793 = vmatprep.subr.mxu1 %v3155_v0  ;;  %2713 = vmatpush3.msra.mxu0 %v3760_v1 }
 0x190   :  { %2714 = vmatprep.mubr.msk.f32.mxu0 %vm3156_vm0, %v3155_v0  ;;  %2794 = vmatpush3.msra.mxu1 %v3603_v21  ;;  %v1425_v21 = vld [vmem:[#allocation8 + $0x70] sm:$0xff] }
 0x191   :  { %2715 = vmatmul.mubr.f32.vlgmr.msra.gmra.mxu0 %v3786_v37  ;;  %2752 = vmatprep.subr.mxu0 %v3155_v0  ;;  %v4054_v37 = vsub.f32 %v1417_v9, %v4047_v6 }
 0x192   :  { %2795 = vmatprep.subr.mxu1 %v3155_v0  ;;  %2753 = vmatpush3.msra.mxu0 %v863_v17  ;;  %v4331_v17 = vand.u32 4294901760, %v3760_v1 }
 0x193   :  { %2796 = vmatpush3.msra.mxu1 %v3606_v25  ;;  %2754 = vmatprep.subr.mxu0 %v3155_v0  ;;  %v3953_v25 = vsub.f32 %v1426_v18, %v3950_v20 }
 0x194   :  { %2797 = vmatprep.subr.mxu1 %v3155_v0  ;;  %2755 = vmatpush3.msra.mxu0 %v870_v34  ;;  %v1422_v34 = vld [vmem:[#allocation8 + $0x58] sm:$0xff] }
 0x195   :  { %2798 = vmatpush3.msra.mxu1 %v3608_v27  ;;  %2756 = vmatprep.subr.mxu0 %v3155_v0  ;;  %v3955_v27 = vand.u32 4294901760, %v1425_v21  ;;  %v3962_v43 = vand.u32 4294901760, %v1422_v34 }
 0x196   :  { %2799 = vmatprep.subr.mxu1 %v3155_v0  ;;  %2757 = vmatpush3.msra.mxu0 %v877_v57  ;;  %v1528_v57 = vand.u32 4294901760, %v3953_v25 }
 0x197   :  { %2800 = vmatpush3.msra.mxu1 %v3611_v28  ;;  %2758 = vmatprep.subr.mxu0 %v3155_v0  ;;  %v1424_v28 = vld [vmem:[#allocation8 + $0x68] sm:$0xff] }
 0x198   :  { %2801 = vmatprep.subr.mxu1 %v3155_v0  ;;  %2759 = vmatpush3.msra.mxu0 %v884_v59  ;;  %v3958_v35 = vand.u32 4294901760, %v1424_v28  ;;  %v3967_v59 = vsub.f32 %v1425_v21, %v3955_v27 }
 0x199   :  { %2802 = vmatpush3.msra.mxu1 %v3613_v29  ;;  %2760 = vmatprep.subr.mxu0 %v3155_v0  ;;  %v1423_v29 = vld [vmem:[#allocation8 + $0x60] sm:$0xff] }
 0x19a   :  { %2803 = vmatprep.subr.mxu1 %v3155_v0  ;;  %2761 = vmatpush3.msra.mxu0 %v891_v61  ;;  %v3960_v40 = vand.u32 4294901760, %v1423_v29  ;;  %v3970_v61 = vand.u32 4294901760, %v1421_v45 }
 0x19b   :  { %2804 = vmatpush3.msra.mxu1 %v3656_v19  ;;  %2762 = vmatprep.subr.mxu0 %v3155_v0 }
 0x19c   :  { %2805 = vmatprep.subr.mxu1 %v3155_v0  ;;  %2763 = vmatpush3.msra.mxu0 %v898_v62  ;;  %v3972_v62 = vand.u32 4294901760, %v1420_v46  ;;  %v3978_v19 = vsub.f32 %v1423_v29, %v3960_v40  ;;  %v3991_v14 = vsub.f32 %v1421_v45, %v3970_v61  ;;  %v1413_v45 = vld [vmem:[#allocation8 + $0x10] sm:$0xff] }
 0x19d   :  { %2806 = vmatpush3.msra.mxu1 %v3688_v2  ;;  %2764 = vmatprep.subr.mxu0 %v3155_v0  ;;  %v1535_v2 = vand.u32 4294901760, %v3967_v59 }
 0x19e   :  { %2807 = vmatprep.subr.mxu1 %v3155_v0  ;;  %2765 = vmatpush3.msra.mxu0 %v905_v63  ;;  %v3975_v63 = vsub.f32 %v1424_v28, %v3958_v35  ;;  %v1549_v50 = vand.u32 4294901760, %v3978_v19 }
 0x19f   :  { %2808 = vmatpush3.msra.mxu1 %v3696_v33  ;;  %2766 = vmatprep.subr.mxu0 %v3155_v0  ;;  %v3995_v33 = vsub.f32 %v1420_v46, %v3972_v62  ;;  %v1536_v15 = vsub.f32 %v3967_v59, %v1535_v2 }
 0x1a0   :  { %2809 = vmatprep.subr.mxu1 %v3155_v0  ;;  %2767 = vmatpush3.msra.mxu0 %v912_v31  ;;  %v3981_v31 = vsub.f32 %v1422_v34, %v3962_v43 }
 0x1a1   :  { %2810 = vmatpush3.msra.mxu1 %v3705_v51  ;;  %2768 = vmatprep.subr.mxu0 %v3155_v0  ;;  %v1570_v49 = vand.u32 4294901760, %v3995_v33 }
 0x1a2   :  { %2811 = vmatprep.subr.mxu1 %v3155_v0  ;;  %2769 = vmatpush3.msra.mxu0 %v919_v52  ;;  %v1529_v52 = vsub.f32 %v3953_v25, %v1528_v57  ;;  %v1556_v51 = vand.u32 4294901760, %v3981_v31 }
 0x1a3   :  { %2812 = vmatpush3.msra.mxu1 %v3717_v16  ;;  %2770 = vmatprep.subr.mxu0 %v3155_v0  ;;  %v1563_v16 = vand.u32 4294901760, %v3991_v14  ;;  %v1571_v8 = vsub.f32 %v3995_v33, %v1570_v49 }
 0x1a4   :  { %2813 = vmatprep.subr.mxu1 %v3155_v0  ;;  %2771 = vmatpush3.msra.mxu0 %v926_v41  ;;  %v1542_v41 = vand.u32 4294901760, %v3975_v63  ;;  %v1557_v32 = vsub.f32 %v3981_v31, %v1556_v51 }
 0x1a5   :  { %2814 = vmatpush3.msra.mxu1 %v3731_v53  ;;  %2772 = vmatprep.subr.mxu0 %v3155_v0  ;;  %v1550_v53 = vsub.f32 %v3978_v19, %v1549_v50  ;;  %v1564_v1 = vsub.f32 %v3991_v14, %v1563_v16  ;;  %v1572_v39 = vand.u32 4294901760, %v1571_v8 }
 0x1a6   :  { %2815 = vmatprep.subr.mxu1 %v3155_v0  ;;  %2773 = vmatpush3.msra.mxu0 %v933_v12  ;;  %v1530_v12 = vand.u32 4294901760, %v1529_v52  ;;  %v1543_v48 = vsub.f32 %v3975_v63, %v1542_v41  ;;  %v1558_v55 = vand.u32 4294901760, %v1557_v32 }
 0x1a7   :  { %2816 = vmatpush3.msra.mxu1 %v3738_v26  ;;  %2774 = vmatprep.subr.mxu0 %v3155_v0  ;;  %v1537_v26 = vand.u32 4294901760, %v1536_v15  ;;  %v1551_v60 = vand.u32 4294901760, %v1550_v53  ;;  %v1565_v44 = vand.u32 4294901760, %v1564_v1  ;;  %v1411_v1 = vld [vmem:[#allocation8] sm:$0xff] }
 0x1a8   :  { %2817 = vmatprep.subr.mxu1 %v3155_v0  ;;  %2775 = vmatpush3.msra.mxu0 %v940_v30  ;;  %v4007_v30 = vsub.f32 %v1419_v47, %v3984_v42 }
 0x1a9   :  { %2818 = vmatpush3.msra.mxu1 %v3752_v54  ;;  %2819 = vmatprep.mubr.msk.f32.mxu1 %vm3156_vm0, %v3155_v0  ;;  %v1544_v54 = vand.u32 4294901760, %v1543_v48  ;;  %v1412_v48 = vld [vmem:[#allocation8 + $0x8] sm:$0xff] }
 0x1aa   :  { %2776 = vmatprep.subr.mxu0 %v3155_v0  ;;  %2820 = vmatmul.mubr.f32.vlgmr.msra.gmra.mxu1 %v3783_v3  ;;  %v1577_v36 = vand.u32 4294901760, %v4007_v30 }
 0x1ab   :  { %2777 = vmatpush3.msra.mxu0 %v4328_v5  ;;  %2784 = vmatprep.mubr.msk.f32.mxu0 %vm3156_vm0, %v3155_v0  ;;  %v1591_v5 = vand.u32 4294901760, %v4054_v37 }
 0x1ac   :  { %2778 = vmatprep.subr.mxu0 %v3155_v0  ;;  %2857 = vmatprep.subr.mxu1 %v3155_v0  ;;  %v1578_v58 = vsub.f32 %v4007_v30, %v1577_v36 }
 0x1ad   :  { %2779 = vmatpush3.msra.mxu0 %v4329_v10  ;;  %2889 = vmatprep.mubr.msk.f32.mxu1 %vm3156_vm0, %v3155_v0  ;;  %v4066_v10 = vsub.f32 %v1416_v22, %v4056_v23  ;;  %v1592_v21 = vsub.f32 %v4054_v37, %v1591_v5 }
 0x1ae   :  { %2780 = vmatprep.subr.mxu0 %v3155_v0  ;;  %2858 = vmatpush3.msra.mxu1 %v1530_v12  ;;  %v1579_v24 = vand.u32 4294901760, %v1578_v58  ;;  %v4089_v12 = vand.u32 4294901760, %v1413_v45 }
 0x1af   :  { %2781 = vmatpush3.msra.mxu0 %v4330_v11  ;;  %2859 = vmatprep.subr.mxu1 %v3155_v0  ;;  %v4068_v11 = vand.u32 4294901760, %v1415_v56  ;;  %v1598_v28 = vand.u32 4294901760, %v4066_v10  ;;  %v1593_v46 = vand.u32 4294901760, %v1592_v21 }
 0x1b0   :  { %2782 = vmatprep.subr.mxu0 %v3155_v0  ;;  %2860 = vmatpush3.msra.mxu1 %v1537_v26  ;;  %v4100_v32 = vsub.f32 %v1413_v45, %v4089_v12 }
 0x1b1   :  { %2783 = vmatpush3.msra.mxu0 %v4331_v17  ;;  %2861 = vmatprep.subr.mxu1 %v3155_v0  ;;  %v1414_v17 = vld [vmem:[#allocation8 + $0x18] sm:$0xff]  ;;  %v4078_v29 = vsub.f32 %v1415_v56, %v4068_v11  ;;  %v1599_v47 = vsub.f32 %v4066_v10, %v1598_v28 }
 0x1b2   :  { %2785 = vmatmul.mubr.f32.vlgmr.msra.gmra.mxu0 %v3783_v3  ;;  %2822 = vmatprep.subr.mxu0 %v3155_v0  ;;  %v1584_v3 = vand.u32 4294901760, %v4045_v4  ;;  %v4082_v34 = vand.u32 4294901760, %v1414_v17  ;;  %v4326_v8 = vand.u32 4294901760, %v4100_v32 }
 0x1b3   :  { %2854 = vmatprep.mubr.msk.f32.mxu0 %vm3156_vm0, %v3155_v0  ;;  %2823 = vmatpush3.msra.mxu0 %v3950_v20  ;;  %v1605_v52 = vand.u32 4294901760, %v4078_v29  ;;  %v1600_v53 = vand.u32 4294901760, %v1599_v47 }
 0x1b4   :  { %2824 = vmatprep.subr.mxu0 %v3155_v0  ;;  %2862 = vmatpush3.msra.mxu1 %v1544_v54  ;;  %v1585_v13 = vsub.f32 %v4045_v4, %v1584_v3  ;;  %v4093_v15 = vsub.f32 %v1414_v17, %v4082_v34  ;;  %v4102_v54 = vand.u32 4294901760, %v1412_v48  ;;  %v1620_v9 = vsub.f32 %v4100_v32, %v4326_v8 }
 0x1b5   :  { %2825 = vmatpush3.msra.mxu0 %v3955_v27  ;;  %2863 = vmatprep.subr.mxu1 %v3155_v0  ;;  %v1606_v26 = vsub.f32 %v4078_v29, %v1605_v52 }
 0x1b6   :  { %2826 = vmatprep.subr.mxu0 %v3155_v0  ;;  %2864 = vmatpush3.msra.mxu1 %v1551_v60  ;;  %v1586_v18 = vand.u32 4294901760, %v1585_v13  ;;  %v4327_v60 = vand.u32 4294901760, %v4093_v15  ;;  %v4110_v38 = vsub.f32 %v1412_v48, %v4102_v54  ;;  %v1621_v56 = vand.u32 4294901760, %v1620_v9  ;;  %v2094_v9 = vld [vmem:[%s4316_s4] ss:$0 sm:$0xff] }
 0x1b7   :  { %2827 = vmatpush3.msra.mxu0 %v3958_v35  ;;  %2865 = vmatprep.subr.mxu1 %v3155_v0 }
 0x1b8   :  { %2828 = vmatprep.subr.mxu0 %v3155_v0  ;;  %2866 = vmatpush3.msra.mxu1 %v1558_v55  ;;  %v1607_v55 = vand.u32 4294901760, %v1606_v26  ;;  %v1613_v58 = vsub.f32 %v4093_v15, %v4327_v60 }
 0x1b9   :  { %2829 = vmatpush3.msra.mxu0 %v3960_v40  ;;  %2867 = vmatprep.subr.mxu1 %v3155_v0 }
 0x1ba   :  { %2830 = vmatprep.subr.mxu0 %v3155_v0  ;;  %2868 = vmatpush3.msra.mxu1 %v1565_v44  ;;  %v4112_v44 = vand.u32 4294901760, %v1411_v1 }
 0x1bb   :  { %2831 = vmatpush3.msra.mxu0 %v3962_v43  ;;  %2869 = vmatprep.subr.mxu1 %v3155_v0 }
 0x1bc   :  { %2832 = vmatprep.subr.mxu0 %v3155_v0  ;;  %2870 = vmatpush3.msra.mxu1 %v1572_v39  ;;  %v4325_v39 = vand.u32 4294901760, %v4110_v38  ;;  %v4125_v22 = vsub.f32 %v1411_v1, %v4112_v44 }
 0x1bd   :  { %2833 = vmatpush3.msra.mxu0 %v3970_v61  ;;  %2871 = vmatprep.subr.mxu1 %v3155_v0 }
 0x1be   :  { %2834 = vmatprep.subr.mxu0 %v3155_v0  ;;  %2872 = vmatpush3.msra.mxu1 %v1579_v24  ;;  %v1614_v24 = vand.u32 4294901760, %v1613_v58  ;;  %v1627_v13 = vsub.f32 %v4110_v38, %v4325_v39  ;;  %v4324_v17 = vand.u32 4294901760, %v4125_v22 }
 0x1bf   :  { %2835 = vmatpush3.msra.mxu0 %v3972_v62  ;;  %2873 = vmatprep.subr.mxu1 %v3155_v0 }
 0x1c0   :  { %2836 = vmatprep.subr.mxu0 %v3155_v0  ;;  %2874 = vmatpush3.msra.mxu1 %v1586_v18  ;;  %v1628_v18 = vand.u32 4294901760, %v1627_v13  ;;  %v1634_v21 = vsub.f32 %v4125_v22, %v4324_v17 }
 0x1c1   :  { %2837 = vmatpush3.msra.mxu0 %v3984_v42  ;;  %2875 = vmatprep.subr.mxu1 %v3155_v0 }
 0x1c2   :  { %2838 = vmatprep.subr.mxu0 %v3155_v0  ;;  %2876 = vmatpush3.msra.mxu1 %v1593_v46  ;;  %v1635_v45 = vand.u32 4294901760, %v1634_v21 }
 0x1c3   :  { %2839 = vmatpush3.msra.mxu0 %v4039_v7  ;;  %2877 = vmatprep.subr.mxu1 %v3155_v0 }
 0x1c4   :  { %2840 = vmatprep.subr.mxu0 %v3155_v0  ;;  %2878 = vmatpush3.msra.mxu1 %v1600_v53 }
 0x1c5   :  { %2841 = vmatpush3.msra.mxu0 %v4047_v6  ;;  %2879 = vmatprep.subr.mxu1 %v3155_v0 }
 0x1c6   :  { %2842 = vmatprep.subr.mxu0 %v3155_v0  ;;  %2880 = vmatpush3.msra.mxu1 %v1607_v55 }
 0x1c7   :  { %2843 = vmatpush3.msra.mxu0 %v4056_v23  ;;  %2881 = vmatprep.subr.mxu1 %v3155_v0 }
 0x1c8   :  { %2844 = vmatprep.subr.mxu0 %v3155_v0  ;;  %2882 = vmatpush3.msra.mxu1 %v1614_v24 }
 0x1c9   :  { %2845 = vmatpush3.msra.mxu0 %v4068_v11  ;;  %2883 = vmatprep.subr.mxu1 %v3155_v0 }
 0x1ca   :  { %2846 = vmatprep.subr.mxu0 %v3155_v0  ;;  %2884 = vmatpush3.msra.mxu1 %v1621_v56 }
 0x1cb   :  { %2847 = vmatpush3.msra.mxu0 %v4082_v34  ;;  %2885 = vmatprep.subr.mxu1 %v3155_v0 }
 0x1cc   :  { %2848 = vmatprep.subr.mxu0 %v3155_v0  ;;  %2886 = vmatpush3.msra.mxu1 %v1628_v18 }
 0x1cd   :  { %2849 = vmatpush3.msra.mxu0 %v4089_v12  ;;  %2887 = vmatprep.subr.mxu1 %v3155_v0 }
 0x1ce   :  { %2850 = vmatprep.subr.mxu0 %v3155_v0  ;;  %2888 = vmatpush3.msra.mxu1 %v1635_v45 }
 0x1cf   :  { %2851 = vmatpush3.msra.mxu0 %v4102_v54  ;;  %2927 = vmatprep.subr.mxu1 %v3155_v0 }
 0x1d0   :  { %2852 = vmatprep.subr.mxu0 %v3155_v0 }
 0x1d1   :  { %2853 = vmatpush3.msra.mxu0 %v4112_v44 }
 0x1d2   :  { %2892 = vmatprep.subr.mxu0 %v3155_v0 }
 0x228   :  { %v1007_v46 = vpop.f32.mrf.mxu1 }
 0x22a   :  { %v2681_v47 = vpop.f32.mrf.mxu1 }
 0x230   :  { %v856_v48 = vpop.f32.mrf.mxu0 }
 0x231   :  { %v857_v24 = vadd.f32 %v2094_v9, %v856_v48 }
 0x232   :  { %v2646_v53 = vpop.f32.mrf.mxu0 }
 0x233   :  { %v1008_v13 = vadd.f32 %v1007_v46, %v857_v24 }
 0x248   :  { %v1200_v26 = vpop.f32.mrf.mxu1 }
 0x24a   :  { %v2751_v1 = vpop.f32.mrf.mxu1 }
 0x251   :  { %v1111_v55 = vpop.f32.mrf.mxu0 }
 0x252   :  { %v1112_v21 = vadd.f32 %v1111_v55, %v1008_v13 }
 0x253   :  { %v2716_v58 = vpop.f32.mrf.mxu0 }
 0x254   :  { %v1201_v45 = vadd.f32 %v1200_v26, %v1112_v21 }
 0x26a   :  { %v1406_v56 = vpop.f32.mrf.mxu1 }
 0x26c   :  { %v2821_v18 = vpop.f32.mrf.mxu1 }
 0x272   :  { %v1319_v17 = vpop.f32.mrf.mxu0 }
 0x273   :  { %v1320_v39 = vadd.f32 %v1319_v17, %v1201_v45 }
 0x274   :  { %v2786_v8 = vpop.f32.mrf.mxu0 }
 0x275   :  { %v1407_v47 = vadd.f32 %v1406_v56, %v1320_v39 }
 0x277   :  { %v1410_v60 = vmax.f32 %v1407_v47, 0.0 }
 0x279   :  { %v4145_v53 = vand.u32 4294901760, %v1410_v60 }
 0x27b   :  { %v4148_v1 = vsub.f32 %v1410_v60, %v4145_v53  ;;  %2890 = vmatmul.mubr.f32.vlgmr.msra.gmra.mxu1 %v4145_v53 }
 0x27c   :  { %2928 = vmatpush3.msra.mxu1 %v3950_v20  ;;  %2959 = vmatprep.mubr.msk.f32.mxu1 %vm3156_vm0, %v3155_v0 }
 0x27d   :  { %v1517_v46 = vand.u32 4294901760, %v4148_v1  ;;  %2929 = vmatprep.subr.mxu1 %v3155_v0 }
 0x27e   :  { %2930 = vmatpush3.msra.mxu1 %v3955_v27 }
 0x27f   :  { %2931 = vmatprep.subr.mxu1 %v3155_v0  ;;  %v1518_v8 = vsub.f32 %v4148_v1, %v1517_v46 }
 0x280   :  { %2932 = vmatpush3.msra.mxu1 %v3958_v35 }
 0x281   :  { %2933 = vmatprep.subr.mxu1 %v3155_v0  ;;  %v1519_v60 = vand.u32 4294901760, %v1518_v8 }
 0x282   :  { %2934 = vmatpush3.msra.mxu1 %v3960_v40 }
 0x283   :  { %2935 = vmatprep.subr.mxu1 %v3155_v0  ;;  %2855 = vmatmul.mubr.f32.vlgmr.msra.gmra.mxu0 %v1519_v60 }
 0x284   :  { %2893 = vmatpush3.msra.mxu0 %v3953_v25  ;;  %2936 = vmatpush3.msra.mxu1 %v3962_v43  ;;  %v4333_v25 = vand.u32 4294901760, %v4100_v32 }
 0x285   :  { %2894 = vmatprep.subr.mxu0 %v3155_v0  ;;  %2937 = vmatprep.subr.mxu1 %v3155_v0 }
 0x286   :  { %2895 = vmatpush3.msra.mxu0 %v3967_v59  ;;  %2938 = vmatpush3.msra.mxu1 %v3970_v61 }
 0x287   :  { %2896 = vmatprep.subr.mxu0 %v3155_v0  ;;  %2939 = vmatprep.subr.mxu1 %v3155_v0 }
 0x288   :  { %2897 = vmatpush3.msra.mxu0 %v3975_v63  ;;  %2940 = vmatpush3.msra.mxu1 %v3972_v62 }
 0x289   :  { %2898 = vmatprep.subr.mxu0 %v3155_v0  ;;  %2941 = vmatprep.subr.mxu1 %v3155_v0 }
 0x28a   :  { %2899 = vmatpush3.msra.mxu0 %v3978_v19  ;;  %2942 = vmatpush3.msra.mxu1 %v3984_v42 }
 0x28b   :  { %2900 = vmatprep.subr.mxu0 %v3155_v0  ;;  %2943 = vmatprep.subr.mxu1 %v3155_v0 }
 0x28c   :  { %2901 = vmatpush3.msra.mxu0 %v3981_v31  ;;  %2944 = vmatpush3.msra.mxu1 %v4039_v7  ;;  %v2095_v31 = vld [vmem:[%s4318_s6] ss:$0 sm:$0xff] }
 0x28d   :  { %2902 = vmatprep.subr.mxu0 %v3155_v0  ;;  %2945 = vmatprep.subr.mxu1 %v3155_v0 }
 0x28e   :  { %2903 = vmatpush3.msra.mxu0 %v3991_v14  ;;  %2946 = vmatpush3.msra.mxu1 %v4047_v6 }
 0x28f   :  { %2904 = vmatprep.subr.mxu0 %v3155_v0  ;;  %2947 = vmatprep.subr.mxu1 %v3155_v0 }
 0x290   :  { %2905 = vmatpush3.msra.mxu0 %v3995_v33  ;;  %2948 = vmatpush3.msra.mxu1 %v4056_v23 }
 0x291   :  { %2906 = vmatprep.subr.mxu0 %v3155_v0  ;;  %2949 = vmatprep.subr.mxu1 %v3155_v0 }
 0x292   :  { %2907 = vmatpush3.msra.mxu0 %v4007_v30  ;;  %2950 = vmatpush3.msra.mxu1 %v4068_v11 }
 0x293   :  { %2908 = vmatprep.subr.mxu0 %v3155_v0  ;;  %2951 = vmatprep.subr.mxu1 %v3155_v0 }
 0x294   :  { %2909 = vmatpush3.msra.mxu0 %v4045_v4  ;;  %2952 = vmatpush3.msra.mxu1 %v4082_v34 }
 0x295   :  { %2910 = vmatprep.subr.mxu0 %v3155_v0  ;;  %2953 = vmatprep.subr.mxu1 %v3155_v0 }
 0x296   :  { %2911 = vmatpush3.msra.mxu0 %v4054_v37  ;;  %2954 = vmatpush3.msra.mxu1 %v4089_v12 }
 0x297   :  { %2912 = vmatprep.subr.mxu0 %v3155_v0  ;;  %2955 = vmatprep.subr.mxu1 %v3155_v0 }
 0x298   :  { %2913 = vmatpush3.msra.mxu0 %v4066_v10  ;;  %2956 = vmatpush3.msra.mxu1 %v4102_v54 }
 0x299   :  { %2914 = vmatprep.subr.mxu0 %v3155_v0  ;;  %2957 = vmatprep.subr.mxu1 %v3155_v0 }
 0x29a   :  { %2915 = vmatpush3.msra.mxu0 %v4078_v29  ;;  %2958 = vmatpush3.msra.mxu1 %v4112_v44 }
 0x29b   :  { %2916 = vmatprep.subr.mxu0 %v3155_v0  ;;  %2960 = vmatmul.mubr.f32.vlgmr.msra.gmra.mxu1 %v1517_v46 }
 0x29c   :  { %2997 = vmatprep.subr.mxu1 %v3155_v0  ;;  %2917 = vmatpush3.msra.mxu0 %v4093_v15 }
 0x29d   :  { %2998 = vmatpush3.msra.mxu1 %v3950_v20  ;;  %2918 = vmatprep.subr.mxu0 %v3155_v0  ;;  %v4332_v20 = vand.u32 4294901760, %v4093_v15 }
 0x29e   :  { %2999 = vmatprep.subr.mxu1 %v3155_v0  ;;  %2919 = vmatpush3.msra.mxu0 %v4100_v32 }
 0x29f   :  { %3000 = vmatpush3.msra.mxu1 %v3955_v27  ;;  %2920 = vmatprep.subr.mxu0 %v3155_v0  ;;  %v4334_v27 = vand.u32 4294901760, %v4110_v38 }
 0x2a0   :  { %3001 = vmatprep.subr.mxu1 %v3155_v0  ;;  %2921 = vmatpush3.msra.mxu0 %v4110_v38 }
 0x2a1   :  { %3002 = vmatpush3.msra.mxu1 %v3958_v35  ;;  %2922 = vmatprep.subr.mxu0 %v3155_v0  ;;  %v4335_v35 = vand.u32 4294901760, %v4125_v22 }
 0x2a2   :  { %3003 = vmatprep.subr.mxu1 %v3155_v0  ;;  %2923 = vmatpush3.msra.mxu0 %v4125_v22 }
 0x2a3   :  { %2924 = vmatprep.mubr.msk.f32.mxu0 %vm3156_vm0, %v3155_v0  ;;  %3004 = vmatpush3.msra.mxu1 %v3960_v40 }
 0x2a4   :  { %2925 = vmatmul.mubr.f32.vlgmr.msra.gmra.mxu0 %v4148_v1  ;;  %2962 = vmatprep.subr.mxu0 %v3155_v0 }
 0x2a5   :  { %3005 = vmatprep.subr.mxu1 %v3155_v0  ;;  %2963 = vmatpush3.msra.mxu0 %v1528_v57 }
 0x2a6   :  { %3006 = vmatpush3.msra.mxu1 %v3962_v43  ;;  %2964 = vmatprep.subr.mxu0 %v3155_v0 }
 0x2a7   :  { %3007 = vmatprep.subr.mxu1 %v3155_v0  ;;  %2965 = vmatpush3.msra.mxu0 %v1535_v2 }
 0x2a8   :  { %3008 = vmatpush3.msra.mxu1 %v3970_v61  ;;  %2966 = vmatprep.subr.mxu0 %v3155_v0 }
 0x2a9   :  { %3009 = vmatprep.subr.mxu1 %v3155_v0  ;;  %2967 = vmatpush3.msra.mxu0 %v1542_v41 }
 0x2aa   :  { %3010 = vmatpush3.msra.mxu1 %v3972_v62  ;;  %2968 = vmatprep.subr.mxu0 %v3155_v0 }
 0x2ab   :  { %3011 = vmatprep.subr.mxu1 %v3155_v0  ;;  %2969 = vmatpush3.msra.mxu0 %v1549_v50 }
 0x2ac   :  { %3012 = vmatpush3.msra.mxu1 %v3984_v42  ;;  %2970 = vmatprep.subr.mxu0 %v3155_v0 }
 0x2ad   :  { %3013 = vmatprep.subr.mxu1 %v3155_v0  ;;  %2971 = vmatpush3.msra.mxu0 %v1556_v51 }
 0x2ae   :  { %3014 = vmatpush3.msra.mxu1 %v4039_v7  ;;  %2972 = vmatprep.subr.mxu0 %v3155_v0 }
 0x2af   :  { %3015 = vmatprep.subr.mxu1 %v3155_v0  ;;  %2973 = vmatpush3.msra.mxu0 %v1563_v16 }
 0x2b0   :  { %3016 = vmatpush3.msra.mxu1 %v4047_v6  ;;  %2974 = vmatprep.subr.mxu0 %v3155_v0 }
 0x2b1   :  { %3017 = vmatprep.subr.mxu1 %v3155_v0  ;;  %2975 = vmatpush3.msra.mxu0 %v1570_v49 }
 0x2b2   :  { %3018 = vmatpush3.msra.mxu1 %v4056_v23  ;;  %2976 = vmatprep.subr.mxu0 %v3155_v0 }
 0x2b3   :  { %3019 = vmatprep.subr.mxu1 %v3155_v0  ;;  %2977 = vmatpush3.msra.mxu0 %v1577_v36 }
 0x2b4   :  { %3020 = vmatpush3.msra.mxu1 %v4068_v11  ;;  %2978 = vmatprep.subr.mxu0 %v3155_v0 }
 0x2b5   :  { %3021 = vmatprep.subr.mxu1 %v3155_v0  ;;  %2979 = vmatpush3.msra.mxu0 %v1584_v3 }
 0x2b6   :  { %3022 = vmatpush3.msra.mxu1 %v4082_v34  ;;  %2980 = vmatprep.subr.mxu0 %v3155_v0 }
 0x2b7   :  { %3023 = vmatprep.subr.mxu1 %v3155_v0  ;;  %2981 = vmatpush3.msra.mxu0 %v1591_v5 }
 0x2b8   :  { %3024 = vmatpush3.msra.mxu1 %v4089_v12  ;;  %2982 = vmatprep.subr.mxu0 %v3155_v0 }
 0x2b9   :  { %3025 = vmatprep.subr.mxu1 %v3155_v0  ;;  %2983 = vmatpush3.msra.mxu0 %v1598_v28 }
 0x2ba   :  { %3026 = vmatpush3.msra.mxu1 %v4102_v54  ;;  %2984 = vmatprep.subr.mxu0 %v3155_v0 }
 0x2bb   :  { %3027 = vmatprep.subr.mxu1 %v3155_v0  ;;  %2985 = vmatpush3.msra.mxu0 %v1605_v52 }
 0x2bc   :  { %3028 = vmatpush3.msra.mxu1 %v4112_v44  ;;  %3029 = vmatprep.mubr.msk.f32.mxu1 %vm3156_vm0, %v3155_v0 }
 0x2bd   :  { %2986 = vmatprep.subr.mxu0 %v3155_v0  ;;  %3030 = vmatmul.mubr.f32.vlgmr.msra.gmra.mxu1 %v4145_v53 }
 0x2be   :  { %2987 = vmatpush3.msra.mxu0 %v4332_v20  ;;  %2994 = vmatprep.mubr.msk.f32.mxu0 %vm3156_vm0, %v3155_v0 }
 0x2bf   :  { %2988 = vmatprep.subr.mxu0 %v3155_v0 }
 0x2c0   :  { %2989 = vmatpush3.msra.mxu0 %v4333_v25 }
 0x2c1   :  { %2990 = vmatprep.subr.mxu0 %v3155_v0 }
 0x2c2   :  { %2991 = vmatpush3.msra.mxu0 %v4334_v27 }
 0x2c3   :  { %2992 = vmatprep.subr.mxu0 %v3155_v0 }
 0x2c4   :  { %2993 = vmatpush3.msra.mxu0 %v4335_v35 }
 0x2c5   :  { %2995 = vmatmul.mubr.f32.vlgmr.msra.gmra.mxu0 %v4145_v53 }
 0x33b   :  { %v1672_v40 = vpop.f32.mrf.mxu1 }
 0x33d   :  { %v2891_v43 = vpop.f32.mrf.mxu1 }
 0x343   :  { %v1521_v57 = vpop.f32.mrf.mxu0 }
 0x344   :  { %v1522_v42 = vadd.f32 %v2095_v31, %v1521_v57 }
 0x345   :  { %v2856_v59 = vpop.f32.mrf.mxu0 }
 0x346   :  { %v1673_v0 = vadd.f32 %v1672_v40, %v1522_v42 }
 0x35b   :  { %v1865_v61 = vpop.f32.mrf.mxu1 }
 0x35d   :  { %v2961_v62 = vpop.f32.mrf.mxu1 }
 0x364   :  { %v1776_v63 = vpop.f32.mrf.mxu0 }
 0x365   :  { %v1777_v33 = vadd.f32 %v1776_v63, %v1673_v0 }
 0x366   :  { %v2926_v19 = vpop.f32.mrf.mxu0 }
 0x367   :  { %v1866_v41 = vadd.f32 %v1865_v61, %v1777_v33 }
 0x37d   :  { %v2071_v2 = vpop.f32.mrf.mxu1 }
 0x37f   :  { %v3031_v14 = vpop.f32.mrf.mxu1 }
 0x385   :  { %v1984_v50 = vpop.f32.mrf.mxu0 }
 0x386   :  { %v1985_v51 = vadd.f32 %v1984_v50, %v1866_v41 }
 0x387   :  { %v2996_v16 = vpop.f32.mrf.mxu0 }
 0x388   :  { %v2072_v30 = vadd.f32 %v2071_v2, %v1985_v51 }
 0x38a   :  { %2075 = vst [vmem:[#allocation10] sm:$0xff] %v2072_v30 }
 0x38b   :  { %3132 = shalt.err (!%p3129_p10)
}
 0x38c   :  { %2085 = dma.vmem_to_hbm [thread:$0]  %s2083_s24, 128, %s4319_s7, [#allocation4]  }
 0x38d   :  { %3147 = dma.done.wait [#allocation4], 128  }
 0x38e   :  { %3148 = vsyncadd [#allocation4], 4294967168 }
 0x38f   :  { %2089 = vsyncpa [#allocation3], 1 }
 0x390   :  { %2090 = vsyncpa [#allocation6], 1 }
 0x391   :  { %2091 = vsyncpa [#allocation9], 1 }
 0x392   :  { %2092 = vsyncpa [#allocation4], 1 }

</bundles_post_ra>
